<compile_context>
chip_gen: v5e
topology: v5e:2x2
jax: 0.10.0
libtpu: 0.0.40
codegen_flags: <defaults>
</compile_context>

<pallas_src>
import math
import functools

import jax
import jax.numpy as jnp
from jax.experimental import pallas as pl
from jax.experimental.pallas import tpu as pltpu


def _round_up(x, m):
    return ((x + m - 1) // m) * m


# ----------------------------- linear (tiled) ------------------------------

def _linear_kernel(x_ref, w_ref, b_ref, o_ref, acc_ref, *, act):
    @pl.when(pl.program_id(2) == 0)
    def _():
        acc_ref[...] = jnp.zeros_like(acc_ref)

    acc_ref[...] += jnp.dot(x_ref[...], w_ref[...],
                            preferred_element_type=jnp.float32)

    @pl.when(pl.program_id(2) == pl.num_programs(2) - 1)
    def _():
        y = acc_ref[...] + b_ref[...]
        if act == "gelu":
            # TODO(synk): HF BERT default "gelu" is erf-based; tanh approximation used here.
            y = jax.nn.gelu(y, approximate=True)
        o_ref[...] = y.astype(o_ref.dtype)


def linear(x, w, b, act=None, out_dtype=jnp.bfloat16,
           tm_max=256, tn_max=256, tk_max=512):
    """y = act(x @ w + b). bf16 matmul inputs, f32 accumulation, tiled M/N/K grid."""
    M, K = x.shape
    _, N = w.shape
    tm = min(tm_max, _round_up(M, 8))
    tn = min(tn_max, _round_up(N, 128))
    tk = min(tk_max, _round_up(K, 128))
    Mp, Np, Kp = _round_up(M, tm), _round_up(N, tn), _round_up(K, tk)

    xp = jnp.pad(x.astype(jnp.bfloat16), ((0, Mp - M), (0, Kp - K)))
    wp = jnp.pad(w.astype(jnp.bfloat16), ((0, Kp - K), (0, Np - N)))
    bp = jnp.pad(b.astype(jnp.float32), (0, Np - N)).reshape(1, Np)

    out = pl.pallas_call(
        functools.partial(_linear_kernel, act=act),
        grid=(Mp // tm, Np // tn, Kp // tk),
        in_specs=[
            pl.BlockSpec((tm, tk), lambda i, j, k: (i, k)),
            pl.BlockSpec((tk, tn), lambda i, j, k: (k, j)),
            pl.BlockSpec((1, tn), lambda i, j, k: (0, j)),
        ],
        out_specs=pl.BlockSpec((tm, tn), lambda i, j, k: (i, j)),
        out_shape=jax.ShapeDtypeStruct((Mp, Np), out_dtype),
        scratch_shapes=[pltpu.VMEM((tm, tn), jnp.float32)],
        compiler_params=pltpu.CompilerParams(
            dimension_semantics=("parallel", "parallel", "arbitrary"),
            vmem_limit_bytes=32 * 1024 * 1024),
    )(xp, wp, bp)
    return out[:M, :N]


# ---------------------- (residual-add +) layernorm --------------------------

def _ln_kernel(*refs, eps, residual):
    if residual:
        x_ref, r_ref, g_ref, b_ref, o_ref = refs
        x = x_ref[...].astype(jnp.float32) + r_ref[...].astype(jnp.float32)
    else:
        x_ref, g_ref, b_ref, o_ref = refs
        x = x_ref[...].astype(jnp.float32)
    mu = jnp.mean(x, axis=-1, keepdims=True)
    var = jnp.mean(jnp.square(x - mu), axis=-1, keepdims=True)
    y = (x - mu) * jax.lax.rsqrt(var + eps)
    o_ref[...] = (y * g_ref[...] + b_ref[...]).astype(o_ref.dtype)


def layernorm(x, g, b, residual=None, eps=1e-12, out_dtype=jnp.bfloat16, tm_max=512):
    M, H = x.shape
    tm = min(tm_max, _round_up(M, 8))
    Mp = _round_up(M, tm)

    ins = [jnp.pad(x, ((0, Mp - M), (0, 0)))]
    in_specs = [pl.BlockSpec((tm, H), lambda i: (i, 0))]
    if residual is not None:
        ins.append(jnp.pad(residual, ((0, Mp - M), (0, 0))))
        in_specs.append(pl.BlockSpec((tm, H), lambda i: (i, 0)))
    ins += [g.astype(jnp.float32).reshape(1, H), b.astype(jnp.float32).reshape(1, H)]
    in_specs += [pl.BlockSpec((1, H), lambda i: (0, 0)),
                 pl.BlockSpec((1, H), lambda i: (0, 0))]

    out = pl.pallas_call(
        functools.partial(_ln_kernel, eps=eps, residual=residual is not None),
        grid=(Mp // tm,),
        in_specs=in_specs,
        out_specs=pl.BlockSpec((tm, H), lambda i: (i, 0)),
        out_shape=jax.ShapeDtypeStruct((Mp, H), out_dtype),
        compiler_params=pltpu.CompilerParams(dimension_semantics=("parallel",)),
    )(*ins)
    return out[:M]


# ------------------------------- attention ---------------------------------

def _attention_kernel(q_ref, k_ref, v_ref, bias_ref, o_ref, *, num_heads, scale):
    # TODO(synk): for long sequences convert to a flash-style online-softmax KV loop.
    q = q_ref[0]                              # (S, H) bf16
    k = k_ref[0]
    v = v_ref[0]
    bias = bias_ref[0].astype(jnp.float32)    # (1, S), precomputed additive mask bias
    S, H = q.shape
    dh = H // num_heads

    parts = []
    for h in range(num_heads):                # static unroll over heads
        qh = q[:, h * dh:(h + 1) * dh]
        kh = k[:, h * dh:(h + 1) * dh]
        vh = v[:, h * dh:(h + 1) * dh]
        # q @ k^T without materializing a transpose.
        s = jax.lax.dot_general(qh, kh, (((1,), (1,)), ((), ())),
                                preferred_element_type=jnp.float32) * scale
        s = s + bias
        s = s - jnp.max(s, axis=-1, keepdims=True)
        p = jnp.exp(s)
        p = p * pl.reciprocal(jnp.sum(p, axis=-1, keepdims=True), approx=True)
        parts.append(jnp.dot(p.astype(vh.dtype), vh,
                             preferred_element_type=jnp.float32))
    out = jnp.concatenate(parts, axis=-1)     # (S, H) f32
    o_ref[...] = out[None].astype(o_ref.dtype)


def attention(q, k, v, bias, num_heads):
    # q, k, v: (B, S, H) bf16 (heads sliced inside the kernel); bias: (B, 1, S) f32.
    B, S, H = q.shape
    dh = H // num_heads
    scale = 1.0 / math.sqrt(dh)
    qkv_spec = pl.BlockSpec((1, S, H), lambda b: (b, 0, 0))
    return pl.pallas_call(
        functools.partial(_attention_kernel, num_heads=num_heads, scale=scale),
        grid=(B,),
        in_specs=[qkv_spec, qkv_spec, qkv_spec,
                  pl.BlockSpec((1, 1, S), lambda b: (b, 0, 0))],
        out_specs=pl.BlockSpec((1, S, H), lambda b: (b, 0, 0)),
        out_shape=jax.ShapeDtypeStruct((B, S, H), jnp.bfloat16),
        compiler_params=pltpu.CompilerParams(dimension_semantics=("parallel",)),
    )(q, k, v, bias)


# ----------------------------- cross entropy --------------------------------

def _ce_kernel(logits_ref, labels_ref, w_ref, loss_ref, acc_ref, *, denom):
    @pl.when(pl.program_id(0) == 0)
    def _():
        acc_ref[...] = jnp.zeros_like(acc_ref)

    logits = logits_ref[...].astype(jnp.float32)          # (tm, T)
    labels = labels_ref[...]                               # (tm, 1) int32
    w = w_ref[...]                                         # (tm, 1) f32 (0 for padded rows)
    m = jnp.max(logits, axis=-1, keepdims=True)
    z = logits - m
    lse = jnp.log(jnp.sum(jnp.exp(z), axis=-1, keepdims=True))
    iota = jax.lax.broadcasted_iota(jnp.int32, logits.shape, 1)
    picked = jnp.sum(jnp.where(iota == labels, z, 0.0), axis=-1, keepdims=True)
    nll = (lse - picked) * w                               # (tm, 1)
    acc_ref[...] += jnp.sum(nll, axis=0, keepdims=True)

    @pl.when(pl.program_id(0) == pl.num_programs(0) - 1)
    def _():
        loss_ref[...] = acc_ref[...] / denom


def cross_entropy(logits, labels):
    # TODO(synk): matches modern HF BertForTokenClassification (mean CE over ALL
    # tokens, no attention-mask / ignore_index masking of padded positions).
    M, T = logits.shape
    tm = min(1024, _round_up(M, 8))
    Mp = _round_up(M, tm)
    logits_p = jnp.pad(logits.astype(jnp.float32), ((0, Mp - M), (0, 0)))
    labels_p = jnp.pad(labels.reshape(M, 1).astype(jnp.int32), ((0, Mp - M), (0, 0)))
    w_p = jnp.pad(jnp.ones((M, 1), jnp.float32), ((0, Mp - M), (0, 0)))

    loss = pl.pallas_call(
        functools.partial(_ce_kernel, denom=float(M)),
        grid=(Mp // tm,),
        in_specs=[
            pl.BlockSpec((tm, T), lambda i: (i, 0)),
            pl.BlockSpec((tm, 1), lambda i: (i, 0)),
            pl.BlockSpec((tm, 1), lambda i: (i, 0)),
        ],
        out_specs=pl.BlockSpec((1, 1), lambda i: (0, 0)),
        out_shape=jax.ShapeDtypeStruct((1, 1), jnp.float32),
        scratch_shapes=[pltpu.VMEM((1, 1), jnp.float32)],
        compiler_params=pltpu.CompilerParams(dimension_semantics=("arbitrary",)),
    )(logits_p, labels_p, w_p)
    return loss[0, 0]


# ------------------------- params & forward (glue) --------------------------

def init_params(key, vocab, H, nh, inter, max_pos, type_vocab, num_tags, num_layers):
    keys = iter(jax.random.split(key, 64))

    def nrm(shape):
        return jax.random.normal(next(keys), shape, jnp.float32) * 0.02

    params = {
        "word_emb": nrm((vocab, H)),
        "pos_emb": nrm((max_pos, H)),
        "type_emb": nrm((type_vocab, H)),
        "emb_ln_g": jnp.ones((H,), jnp.float32),
        "emb_ln_b": jnp.zeros((H,), jnp.float32),
        "cls_w": nrm((H, num_tags)),
        "cls_b": jnp.zeros((num_tags,), jnp.float32),
        "layers": [],
    }
    for _ in range(num_layers):
        params["layers"].append({
            # fused QKV projection: one (H, 3H) GEMM per layer
            "w_qkv": nrm((H, 3 * H)), "b_qkv": jnp.zeros((3 * H,), jnp.float32),
            "wo": nrm((H, H)), "bo": jnp.zeros((H,), jnp.float32),
            "ln1_g": jnp.ones((H,), jnp.float32), "ln1_b": jnp.zeros((H,), jnp.float32),
            "w1": nrm((H, inter)), "b1": jnp.zeros((inter,), jnp.float32),
            "w2": nrm((inter, H)), "b2": jnp.zeros((H,), jnp.float32),
            "ln2_g": jnp.ones((H,), jnp.float32), "ln2_b": jnp.zeros((H,), jnp.float32),
        })
    return params


def entity_model_forward(params, ids, mask, token_type_ids, target_tags, *, num_heads):
    """Mirrors BertForTokenClassification(ids, mask, token_type_ids, labels) ->
    (loss, logits). Dropout is identity (eval mode)."""
    B, S = ids.shape
    H = params["word_emb"].shape[1]

    # embeddings (XLA gather glue) + layernorm (Pallas)
    emb = (params["word_emb"][ids]
           + params["pos_emb"][jnp.arange(S)][None, :, :]
           + params["type_emb"][token_type_ids])                      # (B, S, H) f32
    x = layernorm(emb.reshape(B * S, H), params["emb_ln_g"], params["emb_ln_b"])

    # hoisted additive attention-mask bias, computed once
    bias = (1.0 - mask.astype(jnp.float32)).reshape(B, 1, S) * -10000.0

    for lp in params["layers"]:
        qkv = linear(x, lp["w_qkv"], lp["b_qkv"])                     # (B*S, 3H) bf16
        qkv = qkv.reshape(B, S, 3 * H)
        q, k, v = qkv[..., :H], qkv[..., H:2 * H], qkv[..., 2 * H:]
        ctx = attention(q, k, v, bias, num_heads)                     # (B, S, H) bf16
        attn_out = linear(ctx.reshape(B * S, H), lp["wo"], lp["bo"])
        x = layernorm(x, lp["ln1_g"], lp["ln1_b"], residual=attn_out)  # fused add+LN
        ffn = linear(x, lp["w1"], lp["b1"], act="gelu")
        ffn = linear(ffn, lp["w2"], lp["b2"])
        x = layernorm(x, lp["ln2_g"], lp["ln2_b"], residual=ffn)       # fused add+LN

    logits = linear(x, params["cls_w"], params["cls_b"], out_dtype=jnp.float32)
    loss = cross_entropy(logits, target_tags.reshape(-1))
    return loss, logits.reshape(B, S, -1)


# ---------------------------------- main ------------------------------------

if __name__ == "__main__":
    B, S, H, NH, INTER = 2, 8, 32, 4, 64
    VOCAB, MAX_POS, TYPE_VOCAB, NUM_TAGS, LAYERS = 100, 16, 2, 5, 2

    key = jax.random.PRNGKey(0)
    pkey, ikey, tkey = jax.random.split(key, 3)

    params = init_params(pkey, VOCAB, H, NH, INTER, MAX_POS, TYPE_VOCAB, NUM_TAGS, LAYERS)

    ids = jax.random.randint(ikey, (B, S), 0, VOCAB, dtype=jnp.int32)
    mask = jnp.ones((B, S), jnp.int32).at[:, -2:].set(0)          # last 2 tokens are padding
    token_type_ids = jnp.zeros((B, S), jnp.int32)
    target_tags = jax.random.randint(tkey, (B, S), 0, NUM_TAGS, dtype=jnp.int32)

    fwd = jax.jit(functools.partial(entity_model_forward, num_heads=NH))
    loss, logits = fwd(params, ids, mask, token_type_ids, target_tags)
    jax.block_until_ready((loss, logits))

    assert logits.shape == (B, S, NUM_TAGS)
    assert jnp.isfinite(loss)
    print("KERNEL_OK")
</pallas_src>

<mosaic_0001>
module attributes {stable_mosaic.version = 11 : i64} {
  func.func @_ln_kernel(%arg0: i32, %arg1: memref<16x32xf32, #tpu.memory_space<vmem>>, %arg2: memref<1x32xf32, #tpu.memory_space<vmem>>, %arg3: memref<1x32xf32, #tpu.memory_space<vmem>>, %arg4: memref<16x32xbf16, #tpu.memory_space<vmem>>) attributes {dimension_semantics = [#tpu.dimension_semantics<parallel>], iteration_bounds = array<i64: 1>, scalar_prefetch = 0 : i64, scratch_operands = 0 : i64, tpu.core_type = #tpu.core_type<tc>, window_params = [{transform_indices = @transform_0, window_bounds = array<i64: 16, 32>}, {pipeline_mode = #tpu.pipeline_mode<synchronous>, transform_indices = @transform_1, window_bounds = array<i64: 1, 32>}, {pipeline_mode = #tpu.pipeline_mode<synchronous>, transform_indices = @transform_2, window_bounds = array<i64: 1, 32>}, {transform_indices = @transform_3, window_bounds = array<i64: 16, 32>}]} {
    %c0 = arith.constant 0 : index
    %c0_0 = arith.constant 0 : index
    %0 = vector.load %arg1[%c0, %c0_0] : memref<16x32xf32, #tpu.memory_space<vmem>>, vector<16x32xf32>
    %cst = arith.constant dense<0.000000e+00> : vector<16xf32>
    %1 = vector.multi_reduction <add>, %0, %cst [1] : vector<16x32xf32> to vector<16xf32>
    %2 = vector.shape_cast %1 : vector<16xf32> to vector<16x1xf32>
    %cst_1 = arith.constant 3.200000e+01 : f32
    %3 = vector.broadcast %cst_1 : f32 to vector<16x1xf32>
    %4 = arith.divf %2, %3 : vector<16x1xf32>
    %5 = vector.broadcast %4 : vector<16x1xf32> to vector<16x32xf32>
    %6 = arith.subf %0, %5 : vector<16x32xf32>
    %7 = arith.mulf %6, %6 : vector<16x32xf32>
    %cst_2 = arith.constant dense<0.000000e+00> : vector<16xf32>
    %8 = vector.multi_reduction <add>, %7, %cst_2 [1] : vector<16x32xf32> to vector<16xf32>
    %9 = vector.shape_cast %8 : vector<16xf32> to vector<16x1xf32>
    %cst_3 = arith.constant 3.200000e+01 : f32
    %10 = vector.broadcast %cst_3 : f32 to vector<16x1xf32>
    %11 = arith.divf %9, %10 : vector<16x1xf32>
    %12 = vector.broadcast %4 : vector<16x1xf32> to vector<16x32xf32>
    %13 = arith.subf %0, %12 : vector<16x32xf32>
    %cst_4 = arith.constant 9.99999996E-13 : f32
    %14 = vector.broadcast %cst_4 : f32 to vector<16x1xf32>
    %15 = arith.addf %11, %14 : vector<16x1xf32>
    %16 = math.rsqrt %15 : vector<16x1xf32>
    %17 = vector.broadcast %16 : vector<16x1xf32> to vector<16x32xf32>
    %18 = arith.mulf %13, %17 : vector<16x32xf32>
    %c0_5 = arith.constant 0 : index
    %c0_6 = arith.constant 0 : index
    %19 = vector.load %arg2[%c0_5, %c0_6] : memref<1x32xf32, #tpu.memory_space<vmem>>, vector<1x32xf32>
    %20 = vector.broadcast %19 : vector<1x32xf32> to vector<16x32xf32>
    %21 = arith.mulf %18, %20 : vector<16x32xf32>
    %c0_7 = arith.constant 0 : index
    %c0_8 = arith.constant 0 : index
    %22 = vector.load %arg3[%c0_7, %c0_8] : memref<1x32xf32, #tpu.memory_space<vmem>>, vector<1x32xf32>
    %23 = vector.broadcast %22 : vector<1x32xf32> to vector<16x32xf32>
    %24 = arith.addf %21, %23 : vector<16x32xf32>
    %25 = arith.truncf %24 : vector<16x32xf32> to vector<16x32xbf16>
    %c0_9 = arith.constant 0 : index
    %c0_10 = arith.constant 0 : index
    %26 = vector.load %arg4[%c0_9, %c0_10] : memref<16x32xbf16, #tpu.memory_space<vmem>>, vector<16x32xbf16>
    tpu.vector_store %arg4[%c0_9, %c0_10], %25 {strides = array<i32>} : memref<16x32xbf16, #tpu.memory_space<vmem>>, vector<16x32xbf16>,
    return
  }
  func.func @transform_0(%arg0: i32) -> (i32, i32) {
    %c0_i32 = arith.constant 0 : i32
    %c0_i32_0 = arith.constant 0 : i32
    return %arg0, %c0_i32 : i32, i32
  }
  func.func @transform_1(%arg0: i32) -> (i32, i32) {
    %c0_i32 = arith.constant 0 : i32
    %c0_i32_0 = arith.constant 0 : i32
    %c0_i32_1 = arith.constant 0 : i32
    return %c0_i32, %c0_i32_0 : i32, i32
  }
  func.func @transform_2(%arg0: i32) -> (i32, i32) {
    %c0_i32 = arith.constant 0 : i32
    %c0_i32_0 = arith.constant 0 : i32
    %c0_i32_1 = arith.constant 0 : i32
    return %c0_i32, %c0_i32_0 : i32, i32
  }
  func.func @transform_3(%arg0: i32) -> (i32, i32) {
    %c0_i32 = arith.constant 0 : i32
    %c0_i32_0 = arith.constant 0 : i32
    return %arg0, %c0_i32 : i32, i32
  }
}

module attributes {stable_mosaic.version = 11 : i64} {
  func.func @_linear_kernel(%arg0: i32, %arg1: i32, %arg2: i32, %arg3: memref<16x128xbf16, #tpu.memory_space<vmem>>, %arg4: memref<128x128xbf16, #tpu.memory_space<vmem>>, %arg5: memref<1x128xf32, #tpu.memory_space<vmem>>, %arg6: memref<16x128xbf16, #tpu.memory_space<vmem>>, %arg7: memref<16x128xf32, #tpu.memory_space<vmem>>) attributes {dimension_semantics = [#tpu.dimension_semantics<parallel>, #tpu.dimension_semantics<parallel>, #tpu.dimension_semantics<arbitrary>], iteration_bounds = array<i64: 1, 1, 1>, scalar_prefetch = 0 : i64, scratch_operands = 1 : i64, tpu.core_type = #tpu.core_type<tc>, window_params = [{transform_indices = @transform_0, window_bounds = array<i64: 16, 128>}, {transform_indices = @transform_1, window_bounds = array<i64: 128, 128>}, {transform_indices = @transform_2, window_bounds = array<i64: 1, 128>}, {transform_indices = @transform_3, window_bounds = array<i64: 16, 128>}]} {
    %c0_i32 = arith.constant 0 : i32
    %0 = arith.cmpi eq, %arg2, %c0_i32 : i32
    %1 = arith.extui %0 : i1 to i32
    %c0_i32_0 = arith.constant 0 : i32
    %2 = arith.cmpi ne, %1, %c0_i32_0 : i32
    scf.if %2 {
      %cst_10 = arith.constant 0.000000e+00 : f32
      %12 = vector.broadcast %cst_10 : f32 to vector<16x128xf32>
      %c0_11 = arith.constant 0 : index
      %c0_12 = arith.constant 0 : index
      %13 = vector.load %arg7[%c0_11, %c0_12] : memref<16x128xf32, #tpu.memory_space<vmem>>, vector<16x128xf32>
      tpu.vector_store %arg7[%c0_11, %c0_12], %12 {strides = array<i32>} : memref<16x128xf32, #tpu.memory_space<vmem>>, vector<16x128xf32>,
    } else {
    }
    %c0 = arith.constant 0 : index
    %c0_1 = arith.constant 0 : index
    %3 = vector.load %arg7[%c0, %c0_1] : memref<16x128xf32, #tpu.memory_space<vmem>>, vector<16x128xf32>
    %c0_2 = arith.constant 0 : index
    %c0_3 = arith.constant 0 : index
    %4 = vector.load %arg3[%c0_2, %c0_3] : memref<16x128xbf16, #tpu.memory_space<vmem>>, vector<16x128xbf16>
    %c0_4 = arith.constant 0 : index
    %c0_5 = arith.constant 0 : index
    %5 = vector.load %arg4[%c0_4, %c0_5] : memref<128x128xbf16, #tpu.memory_space<vmem>>, vector<128x128xbf16>
    %cst = arith.constant dense<0.000000e+00> : vector<16x128xf32>
    %6 = tpu.matmul %4, %5, %cst {dimension_numbers = #tpu.dot_dimension_numbers<[1], [0], [0], [1], [0, 0, 1, 1], [], []>} : vector<16x128xbf16>, vector<128x128xbf16>, vector<16x128xf32> -> vector<16x128xf32>
    %7 = arith.addf %3, %6 : vector<16x128xf32>
    %c0_6 = arith.constant 0 : index
    %c0_7 = arith.constant 0 : index
    %8 = vector.load %arg7[%c0_6, %c0_7] : memref<16x128xf32, #tpu.memory_space<vmem>>, vector<16x128xf32>
    tpu.vector_store %arg7[%c0_6, %c0_7], %7 {strides = array<i32>} : memref<16x128xf32, #tpu.memory_space<vmem>>, vector<16x128xf32>,
    %c0_i32_8 = arith.constant 0 : i32
    %9 = arith.cmpi eq, %arg2, %c0_i32_8 : i32
    %10 = arith.extui %9 : i1 to i32
    %c0_i32_9 = arith.constant 0 : i32
    %11 = arith.cmpi ne, %10, %c0_i32_9 : i32
    scf.if %11 {
      %c0_10 = arith.constant 0 : index
      %c0_11 = arith.constant 0 : index
      %12 = vector.load %arg7[%c0_10, %c0_11] : memref<16x128xf32, #tpu.memory_space<vmem>>, vector<16x128xf32>
      %c0_12 = arith.constant 0 : index
      %c0_13 = arith.constant 0 : index
      %13 = vector.load %arg5[%c0_12, %c0_13] : memref<1x128xf32, #tpu.memory_space<vmem>>, vector<1x128xf32>
      %14 = vector.broadcast %13 : vector<1x128xf32> to vector<16x128xf32>
      %15 = arith.addf %12, %14 : vector<16x128xf32>
      %16 = arith.truncf %15 : vector<16x128xf32> to vector<16x128xbf16>
      %c0_14 = arith.constant 0 : index
      %c0_15 = arith.constant 0 : index
      %17 = vector.load %arg6[%c0_14, %c0_15] : memref<16x128xbf16, #tpu.memory_space<vmem>>, vector<16x128xbf16>
      tpu.vector_store %arg6[%c0_14, %c0_15], %16 {strides = array<i32>} : memref<16x128xbf16, #tpu.memory_space<vmem>>, vector<16x128xbf16>,
    } else {
    }
    return
  }
  func.func @transform_0(%arg0: i32, %arg1: i32, %arg2: i32) -> (i32, i32) {
    %c0_i32 = arith.constant 0 : i32
    return %arg0, %arg2 : i32, i32
  }
  func.func @transform_1(%arg0: i32, %arg1: i32, %arg2: i32) -> (i32, i32) {
    %c0_i32 = arith.constant 0 : i32
    return %arg2, %arg1 : i32, i32
  }
  func.func @transform_2(%arg0: i32, %arg1: i32, %arg2: i32) -> (i32, i32) {
    %c0_i32 = arith.constant 0 : i32
    %c0_i32_0 = arith.constant 0 : i32
    return %c0_i32, %arg1 : i32, i32
  }
  func.func @transform_3(%arg0: i32, %arg1: i32, %arg2: i32) -> (i32, i32) {
    %c0_i32 = arith.constant 0 : i32
    return %arg0, %arg1 : i32, i32
  }
}

module attributes {stable_mosaic.version = 11 : i64} {
  func.func @_attention_kernel(%arg0: i32, %arg1: memref<1x8x32xbf16, #tpu.memory_space<vmem>>, %arg2: memref<1x8x32xbf16, #tpu.memory_space<vmem>>, %arg3: memref<1x8x32xbf16, #tpu.memory_space<vmem>>, %arg4: memref<1x1x8xf32, #tpu.memory_space<vmem>>, %arg5: memref<1x8x32xbf16, #tpu.memory_space<vmem>>) attributes {dimension_semantics = [#tpu.dimension_semantics<parallel>], iteration_bounds = array<i64: 2>, scalar_prefetch = 0 : i64, scratch_operands = 0 : i64, tpu.core_type = #tpu.core_type<tc>, window_params = [{transform_indices = @transform_0, window_bounds = array<i64: 1, 8, 32>}, {transform_indices = @transform_1, window_bounds = array<i64: 1, 8, 32>}, {transform_indices = @transform_2, window_bounds = array<i64: 1, 8, 32>}, {transform_indices = @transform_3, window_bounds = array<i64: 1, 1, 8>}, {transform_indices = @transform_4, window_bounds = array<i64: 1, 8, 32>}]} {
    %c0 = arith.constant 0 : index
    %c0_0 = arith.constant 0 : index
    %c0_1 = arith.constant 0 : index
    %0 = vector.load %arg1[%c0, %c0_0, %c0_1] : memref<1x8x32xbf16, #tpu.memory_space<vmem>>, vector<1x8x32xbf16>
    %1 = vector.shape_cast %0 : vector<1x8x32xbf16> to vector<8x32xbf16>
    %c0_2 = arith.constant 0 : index
    %c0_3 = arith.constant 0 : index
    %c0_4 = arith.constant 0 : index
    %2 = vector.load %arg2[%c0_2, %c0_3, %c0_4] : memref<1x8x32xbf16, #tpu.memory_space<vmem>>, vector<1x8x32xbf16>
    %3 = vector.shape_cast %2 : vector<1x8x32xbf16> to vector<8x32xbf16>
    %c0_5 = arith.constant 0 : index
    %c0_6 = arith.constant 0 : index
    %c0_7 = arith.constant 0 : index
    %4 = vector.load %arg3[%c0_5, %c0_6, %c0_7] : memref<1x8x32xbf16, #tpu.memory_space<vmem>>, vector<1x8x32xbf16>
    %5 = vector.shape_cast %4 : vector<1x8x32xbf16> to vector<8x32xbf16>
    %c0_8 = arith.constant 0 : index
    %c0_9 = arith.constant 0 : index
    %c0_10 = arith.constant 0 : index
    %6 = vector.load %arg4[%c0_8, %c0_9, %c0_10] : memref<1x1x8xf32, #tpu.memory_space<vmem>>, vector<1x1x8xf32>
    %7 = vector.shape_cast %6 : vector<1x1x8xf32> to vector<1x8xf32>
    %8 = vector.extract_strided_slice %1 {offsets = [0, 0], sizes = [8, 8], strides = [1, 1]} : vector<8x32xbf16> to vector<8x8xbf16>
    %9 = vector.extract_strided_slice %3 {offsets = [0, 0], sizes = [8, 8], strides = [1, 1]} : vector<8x32xbf16> to vector<8x8xbf16>
    %10 = vector.extract_strided_slice %5 {offsets = [0, 0], sizes = [8, 8], strides = [1, 1]} : vector<8x32xbf16> to vector<8x8xbf16>
    %cst = arith.constant dense<0.000000e+00> : vector<8x8xf32>
    %11 = tpu.matmul %8, %9, %cst {dimension_numbers = #tpu.dot_dimension_numbers<[1], [1], [0], [0], [0, 0, 1, 0], [], []>} : vector<8x8xbf16>, vector<8x8xbf16>, vector<8x8xf32> -> vector<8x8xf32>
    %cst_11 = arith.constant 0.353553385 : f32
    %12 = vector.broadcast %cst_11 : f32 to vector<8x8xf32>
    %13 = arith.mulf %11, %12 : vector<8x8xf32>
    %14 = vector.broadcast %7 : vector<1x8xf32> to vector<8x8xf32>
    %15 = arith.addf %13, %14 : vector<8x8xf32>
    %cst_12 = arith.constant dense<0xFF800000> : vector<8xf32>
    %16 = vector.multi_reduction <maximumf>, %15, %cst_12 [1] : vector<8x8xf32> to vector<8xf32>
    %17 = vector.shape_cast %16 : vector<8xf32> to vector<8x1xf32>
    %18 = vector.broadcast %17 : vector<8x1xf32> to vector<8x8xf32>
    %19 = arith.subf %15, %18 : vector<8x8xf32>
    %20 = math.exp %19 : vector<8x8xf32>
    %cst_13 = arith.constant dense<0.000000e+00> : vector<8xf32>
    %21 = vector.multi_reduction <add>, %20, %cst_13 [1] : vector<8x8xf32> to vector<8xf32>
    %22 = vector.shape_cast %21 : vector<8xf32> to vector<8x1xf32>
    %23 = tpu.reciprocal %22 {approx = true} : vector<8x1xf32> -> vector<8x1xf32>
    %24 = vector.broadcast %23 : vector<8x1xf32> to vector<8x8xf32>
    %25 = arith.mulf %20, %24 : vector<8x8xf32>
    %26 = arith.truncf %25 : vector<8x8xf32> to vector<8x8xbf16>
    %cst_14 = arith.constant dense<0.000000e+00> : vector<8x8xf32>
    %27 = tpu.matmul %26, %10, %cst_14 {dimension_numbers = #tpu.dot_dimension_numbers<[1], [0], [0], [1], [0, 0, 1, 1], [], []>} : vector<8x8xbf16>, vector<8x8xbf16>, vector<8x8xf32> -> vector<8x8xf32>
    %28 = vector.extract_strided_slice %1 {offsets = [0, 8], sizes = [8, 8], strides = [1, 1]} : vector<8x32xbf16> to vector<8x8xbf16>
    %29 = vector.extract_strided_slice %3 {offsets = [0, 8], sizes = [8, 8], strides = [1, 1]} : vector<8x32xbf16> to vector<8x8xbf16>
    %30 = vector.extract_strided_slice %5 {offsets = [0, 8], sizes = [8, 8], strides = [1, 1]} : vector<8x32xbf16> to vector<8x8xbf16>
    %cst_15 = arith.constant dense<0.000000e+00> : vector<8x8xf32>
    %31 = tpu.matmul %28, %29, %cst_15 {dimension_numbers = #tpu.dot_dimension_numbers<[1], [1], [0], [0], [0, 0, 1, 0], [], []>} : vector<8x8xbf16>, vector<8x8xbf16>, vector<8x8xf32> -> vector<8x8xf32>
    %cst_16 = arith.constant 0.353553385 : f32
    %32 = vector.broadcast %cst_16 : f32 to vector<8x8xf32>
    %33 = arith.mulf %31, %32 : vector<8x8xf32>
    %34 = vector.broadcast %7 : vector<1x8xf32> to vector<8x8xf32>
    %35 = arith.addf %33, %34 : vector<8x8xf32>
    %cst_17 = arith.constant dense<0xFF800000> : vector<8xf32>
    %36 = vector.multi_reduction <maximumf>, %35, %cst_17 [1] : vector<8x8xf32> to vector<8xf32>
    %37 = vector.shape_cast %36 : vector<8xf32> to vector<8x1xf32>
    %38 = vector.broadcast %37 : vector<8x1xf32> to vector<8x8xf32>
    %39 = arith.subf %35, %38 : vector<8x8xf32>
    %40 = math.exp %39 : vector<8x8xf32>
    %cst_18 = arith.constant dense<0.000000e+00> : vector<8xf32>
    %41 = vector.multi_reduction <add>, %40, %cst_18 [1] : vector<8x8xf32> to vector<8xf32>
    %42 = vector.shape_cast %41 : vector<8xf32> to vector<8x1xf32>
    %43 = tpu.reciprocal %42 {approx = true} : vector<8x1xf32> -> vector<8x1xf32>
    %44 = vector.broadcast %43 : vector<8x1xf32> to vector<8x8xf32>
    %45 = arith.mulf %40, %44 : vector<8x8xf32>
    %46 = arith.truncf %45 : vector<8x8xf32> to vector<8x8xbf16>
    %cst_19 = arith.constant dense<0.000000e+00> : vector<8x8xf32>
    %47 = tpu.matmul %46, %30, %cst_19 {dimension_numbers = #tpu.dot_dimension_numbers<[1], [0], [0], [1], [0, 0, 1, 1], [], []>} : vector<8x8xbf16>, vector<8x8xbf16>, vector<8x8xf32> -> vector<8x8xf32>
    %48 = vector.extract_strided_slice %1 {offsets = [0, 16], sizes = [8, 8], strides = [1, 1]} : vector<8x32xbf16> to vector<8x8xbf16>
    %49 = vector.extract_strided_slice %3 {offsets = [0, 16], sizes = [8, 8], strides = [1, 1]} : vector<8x32xbf16> to vector<8x8xbf16>
    %50 = vector.extract_strided_slice %5 {offsets = [0, 16], sizes = [8, 8], strides = [1, 1]} : vector<8x32xbf16> to vector<8x8xbf16>
    %cst_20 = arith.constant dense<0.000000e+00> : vector<8x8xf32>
    %51 = tpu.matmul %48, %49, %cst_20 {dimension_numbers = #tpu.dot_dimension_numbers<[1], [1], [0], [0], [0, 0, 1, 0], [], []>} : vector<8x8xbf16>, vector<8x8xbf16>, vector<8x8xf32> -> vector<8x8xf32>
    %cst_21 = arith.constant 0.353553385 : f32
    %52 = vector.broadcast %cst_21 : f32 to vector<8x8xf32>
    %53 = arith.mulf %51, %52 : vector<8x8xf32>
    %54 = vector.broadcast %7 : vector<1x8xf32> to vector<8x8xf32>
    %55 = arith.addf %53, %54 : vector<8x8xf32>
    %cst_22 = arith.constant dense<0xFF800000> : vector<8xf32>
    %56 = vector.multi_reduction <maximumf>, %55, %cst_22 [1] : vector<8x8xf32> to vector<8xf32>
    %57 = vector.shape_cast %56 : vector<8xf32> to vector<8x1xf32>
    %58 = vector.broadcast %57 : vector<8x1xf32> to vector<8x8xf32>
    %59 = arith.subf %55, %58 : vector<8x8xf32>
    %60 = math.exp %59 : vector<8x8xf32>
    %cst_23 = arith.constant dense<0.000000e+00> : vector<8xf32>
    %61 = vector.multi_reduction <add>, %60, %cst_23 [1] : vector<8x8xf32> to vector<8xf32>
    %62 = vector.shape_cast %61 : vector<8xf32> to vector<8x1xf32>
    %63 = tpu.reciprocal %62 {approx = true} : vector<8x1xf32> -> vector<8x1xf32>
    %64 = vector.broadcast %63 : vector<8x1xf32> to vector<8x8xf32>
    %65 = arith.mulf %60, %64 : vector<8x8xf32>
    %66 = arith.truncf %65 : vector<8x8xf32> to vector<8x8xbf16>
    %cst_24 = arith.constant dense<0.000000e+00> : vector<8x8xf32>
    %67 = tpu.matmul %66, %50, %cst_24 {dimension_numbers = #tpu.dot_dimension_numbers<[1], [0], [0], [1], [0, 0, 1, 1], [], []>} : vector<8x8xbf16>, vector<8x8xbf16>, vector<8x8xf32> -> vector<8x8xf32>
    %68 = vector.extract_strided_slice %1 {offsets = [0, 24], sizes = [8, 8], strides = [1, 1]} : vector<8x32xbf16> to vector<8x8xbf16>
    %69 = vector.extract_strided_slice %3 {offsets = [0, 24], sizes = [8, 8], strides = [1, 1]} : vector<8x32xbf16> to vector<8x8xbf16>
    %70 = vector.extract_strided_slice %5 {offsets = [0, 24], sizes = [8, 8], strides = [1, 1]} : vector<8x32xbf16> to vector<8x8xbf16>
    %cst_25 = arith.constant dense<0.000000e+00> : vector<8x8xf32>
    %71 = tpu.matmul %68, %69, %cst_25 {dimension_numbers = #tpu.dot_dimension_numbers<[1], [1], [0], [0], [0, 0, 1, 0], [], []>} : vector<8x8xbf16>, vector<8x8xbf16>, vector<8x8xf32> -> vector<8x8xf32>
    %cst_26 = arith.constant 0.353553385 : f32
    %72 = vector.broadcast %cst_26 : f32 to vector<8x8xf32>
    %73 = arith.mulf %71, %72 : vector<8x8xf32>
    %74 = vector.broadcast %7 : vector<1x8xf32> to vector<8x8xf32>
    %75 = arith.addf %73, %74 : vector<8x8xf32>
    %cst_27 = arith.constant dense<0xFF800000> : vector<8xf32>
    %76 = vector.multi_reduction <maximumf>, %75, %cst_27 [1] : vector<8x8xf32> to vector<8xf32>
    %77 = vector.shape_cast %76 : vector<8xf32> to vector<8x1xf32>
    %78 = vector.broadcast %77 : vector<8x1xf32> to vector<8x8xf32>
    %79 = arith.subf %75, %78 : vector<8x8xf32>
    %80 = math.exp %79 : vector<8x8xf32>
    %cst_28 = arith.constant dense<0.000000e+00> : vector<8xf32>
    %81 = vector.multi_reduction <add>, %80, %cst_28 [1] : vector<8x8xf32> to vector<8xf32>
    %82 = vector.shape_cast %81 : vector<8xf32> to vector<8x1xf32>
    %83 = tpu.reciprocal %82 {approx = true} : vector<8x1xf32> -> vector<8x1xf32>
    %84 = vector.broadcast %83 : vector<8x1xf32> to vector<8x8xf32>
    %85 = arith.mulf %80, %84 : vector<8x8xf32>
    %86 = arith.truncf %85 : vector<8x8xf32> to vector<8x8xbf16>
    %cst_29 = arith.constant dense<0.000000e+00> : vector<8x8xf32>
    %87 = tpu.matmul %86, %70, %cst_29 {dimension_numbers = #tpu.dot_dimension_numbers<[1], [0], [0], [1], [0, 0, 1, 1], [], []>} : vector<8x8xbf16>, vector<8x8xbf16>, vector<8x8xf32> -> vector<8x8xf32>
    %88 = tpu.concatenate %27, %47, %67, %87 in 1 : vector<8x8xf32>, vector<8x8xf32>, vector<8x8xf32>, vector<8x8xf32> -> vector<8x32xf32>
    %89 = vector.shape_cast %88 : vector<8x32xf32> to vector<1x8x32xf32>
    %90 = arith.truncf %89 : vector<1x8x32xf32> to vector<1x8x32xbf16>
    %c0_30 = arith.constant 0 : index
    %c0_31 = arith.constant 0 : index
    %c0_32 = arith.constant 0 : index
    %91 = vector.load %arg5[%c0_30, %c0_31, %c0_32] : memref<1x8x32xbf16, #tpu.memory_space<vmem>>, vector<1x8x32xbf16>
    tpu.vector_store %arg5[%c0_30, %c0_31, %c0_32], %90 {strides = array<i32>} : memref<1x8x32xbf16, #tpu.memory_space<vmem>>, vector<1x8x32xbf16>,
    return
  }
  func.func @transform_0(%arg0: i32) -> (i32, i32, i32) {
    %c0_i32 = arith.constant 0 : i32
    %c0_i32_0 = arith.constant 0 : i32
    %c0_i32_1 = arith.constant 0 : i32
    return %arg0, %c0_i32, %c0_i32_0 : i32, i32, i32
  }
  func.func @transform_1(%arg0: i32) -> (i32, i32, i32) {
    %c0_i32 = arith.constant 0 : i32
    %c0_i32_0 = arith.constant 0 : i32
    %c0_i32_1 = arith.constant 0 : i32
    return %arg0, %c0_i32, %c0_i32_0 : i32, i32, i32
  }
  func.func @transform_2(%arg0: i32) -> (i32, i32, i32) {
    %c0_i32 = arith.constant 0 : i32
    %c0_i32_0 = arith.constant 0 : i32
    %c0_i32_1 = arith.constant 0 : i32
    return %arg0, %c0_i32, %c0_i32_0 : i32, i32, i32
  }
  func.func @transform_3(%arg0: i32) -> (i32, i32, i32) {
    %c0_i32 = arith.constant 0 : i32
    %c0_i32_0 = arith.constant 0 : i32
    %c0_i32_1 = arith.constant 0 : i32
    return %arg0, %c0_i32, %c0_i32_0 : i32, i32, i32
  }
  func.func @transform_4(%arg0: i32) -> (i32, i32, i32) {
    %c0_i32 = arith.constant 0 : i32
    %c0_i32_0 = arith.constant 0 : i32
    %c0_i32_1 = arith.constant 0 : i32
    return %arg0, %c0_i32, %c0_i32_0 : i32, i32, i32
  }
}

module attributes {stable_mosaic.version = 11 : i64} {
  func.func @_ln_kernel(%arg0: i32, %arg1: memref<16x32xbf16, #tpu.memory_space<vmem>>, %arg2: memref<16x32xbf16, #tpu.memory_space<vmem>>, %arg3: memref<1x32xf32, #tpu.memory_space<vmem>>, %arg4: memref<1x32xf32, #tpu.memory_space<vmem>>, %arg5: memref<16x32xbf16, #tpu.memory_space<vmem>>) attributes {dimension_semantics = [#tpu.dimension_semantics<parallel>], iteration_bounds = array<i64: 1>, scalar_prefetch = 0 : i64, scratch_operands = 0 : i64, tpu.core_type = #tpu.core_type<tc>, window_params = [{transform_indices = @transform_0, window_bounds = array<i64: 16, 32>}, {transform_indices = @transform_1, window_bounds = array<i64: 16, 32>}, {pipeline_mode = #tpu.pipeline_mode<synchronous>, transform_indices = @transform_2, window_bounds = array<i64: 1, 32>}, {pipeline_mode = #tpu.pipeline_mode<synchronous>, transform_indices = @transform_3, window_bounds = array<i64: 1, 32>}, {transform_indices = @transform_4, window_bounds = array<i64: 16, 32>}]} {
    %c0 = arith.constant 0 : index
    %c0_0 = arith.constant 0 : index
    %0 = vector.load %arg1[%c0, %c0_0] : memref<16x32xbf16, #tpu.memory_space<vmem>>, vector<16x32xbf16>
    %1 = arith.extf %0 : vector<16x32xbf16> to vector<16x32xf32>
    %c0_1 = arith.constant 0 : index
    %c0_2 = arith.constant 0 : index
    %2 = vector.load %arg2[%c0_1, %c0_2] : memref<16x32xbf16, #tpu.memory_space<vmem>>, vector<16x32xbf16>
    %3 = arith.extf %2 : vector<16x32xbf16> to vector<16x32xf32>
    %4 = arith.addf %1, %3 : vector<16x32xf32>
    %cst = arith.constant dense<0.000000e+00> : vector<16xf32>
    %5 = vector.multi_reduction <add>, %4, %cst [1] : vector<16x32xf32> to vector<16xf32>
    %6 = vector.shape_cast %5 : vector<16xf32> to vector<16x1xf32>
    %cst_3 = arith.constant 3.200000e+01 : f32
    %7 = vector.broadcast %cst_3 : f32 to vector<16x1xf32>
    %8 = arith.divf %6, %7 : vector<16x1xf32>
    %9 = vector.broadcast %8 : vector<16x1xf32> to vector<16x32xf32>
    %10 = arith.subf %4, %9 : vector<16x32xf32>
    %11 = arith.mulf %10, %10 : vector<16x32xf32>
    %cst_4 = arith.constant dense<0.000000e+00> : vector<16xf32>
    %12 = vector.multi_reduction <add>, %11, %cst_4 [1] : vector<16x32xf32> to vector<16xf32>
    %13 = vector.shape_cast %12 : vector<16xf32> to vector<16x1xf32>
    %cst_5 = arith.constant 3.200000e+01 : f32
    %14 = vector.broadcast %cst_5 : f32 to vector<16x1xf32>
    %15 = arith.divf %13, %14 : vector<16x1xf32>
    %16 = vector.broadcast %8 : vector<16x1xf32> to vector<16x32xf32>
    %17 = arith.subf %4, %16 : vector<16x32xf32>
    %cst_6 = arith.constant 9.99999996E-13 : f32
    %18 = vector.broadcast %cst_6 : f32 to vector<16x1xf32>
    %19 = arith.addf %15, %18 : vector<16x1xf32>
    %20 = math.rsqrt %19 : vector<16x1xf32>
    %21 = vector.broadcast %20 : vector<16x1xf32> to vector<16x32xf32>
    %22 = arith.mulf %17, %21 : vector<16x32xf32>
    %c0_7 = arith.constant 0 : index
    %c0_8 = arith.constant 0 : index
    %23 = vector.load %arg3[%c0_7, %c0_8] : memref<1x32xf32, #tpu.memory_space<vmem>>, vector<1x32xf32>
    %24 = vector.broadcast %23 : vector<1x32xf32> to vector<16x32xf32>
    %25 = arith.mulf %22, %24 : vector<16x32xf32>
    %c0_9 = arith.constant 0 : index
    %c0_10 = arith.constant 0 : index
    %26 = vector.load %arg4[%c0_9, %c0_10] : memref<1x32xf32, #tpu.memory_space<vmem>>, vector<1x32xf32>
    %27 = vector.broadcast %26 : vector<1x32xf32> to vector<16x32xf32>
    %28 = arith.addf %25, %27 : vector<16x32xf32>
    %29 = arith.truncf %28 : vector<16x32xf32> to vector<16x32xbf16>
    %c0_11 = arith.constant 0 : index
    %c0_12 = arith.constant 0 : index
    %30 = vector.load %arg5[%c0_11, %c0_12] : memref<16x32xbf16, #tpu.memory_space<vmem>>, vector<16x32xbf16>
    tpu.vector_store %arg5[%c0_11, %c0_12], %29 {strides = array<i32>} : memref<16x32xbf16, #tpu.memory_space<vmem>>, vector<16x32xbf16>,
    return
  }
  func.func @transform_0(%arg0: i32) -> (i32, i32) {
    %c0_i32 = arith.constant 0 : i32
    %c0_i32_0 = arith.constant 0 : i32
    return %arg0, %c0_i32 : i32, i32
  }
  func.func @transform_1(%arg0: i32) -> (i32, i32) {
    %c0_i32 = arith.constant 0 : i32
    %c0_i32_0 = arith.constant 0 : i32
    return %arg0, %c0_i32 : i32, i32
  }
  func.func @transform_2(%arg0: i32) -> (i32, i32) {
    %c0_i32 = arith.constant 0 : i32
    %c0_i32_0 = arith.constant 0 : i32
    %c0_i32_1 = arith.constant 0 : i32
    return %c0_i32, %c0_i32_0 : i32, i32
  }
  func.func @transform_3(%arg0: i32) -> (i32, i32) {
    %c0_i32 = arith.constant 0 : i32
    %c0_i32_0 = arith.constant 0 : i32
    %c0_i32_1 = arith.constant 0 : i32
    return %c0_i32, %c0_i32_0 : i32, i32
  }
  func.func @transform_4(%arg0: i32) -> (i32, i32) {
    %c0_i32 = arith.constant 0 : i32
    %c0_i32_0 = arith.constant 0 : i32
    return %arg0, %c0_i32 : i32, i32
  }
}

module attributes {stable_mosaic.version = 11 : i64} {
  func.func @_linear_kernel(%arg0: i32, %arg1: i32, %arg2: i32, %arg3: memref<16x128xbf16, #tpu.memory_space<vmem>>, %arg4: memref<128x128xbf16, #tpu.memory_space<vmem>>, %arg5: memref<1x128xf32, #tpu.memory_space<vmem>>, %arg6: memref<16x128xbf16, #tpu.memory_space<vmem>>, %arg7: memref<16x128xf32, #tpu.memory_space<vmem>>) attributes {dimension_semantics = [#tpu.dimension_semantics<parallel>, #tpu.dimension_semantics<parallel>, #tpu.dimension_semantics<arbitrary>], iteration_bounds = array<i64: 1, 1, 1>, scalar_prefetch = 0 : i64, scratch_operands = 1 : i64, tpu.core_type = #tpu.core_type<tc>, window_params = [{transform_indices = @transform_0, window_bounds = array<i64: 16, 128>}, {transform_indices = @transform_1, window_bounds = array<i64: 128, 128>}, {transform_indices = @transform_2, window_bounds = array<i64: 1, 128>}, {transform_indices = @transform_3, window_bounds = array<i64: 16, 128>}]} {
    %c0_i32 = arith.constant 0 : i32
    %0 = arith.cmpi eq, %arg2, %c0_i32 : i32
    %1 = arith.extui %0 : i1 to i32
    %c0_i32_0 = arith.constant 0 : i32
    %2 = arith.cmpi ne, %1, %c0_i32_0 : i32
    scf.if %2 {
      %cst_10 = arith.constant 0.000000e+00 : f32
      %12 = vector.broadcast %cst_10 : f32 to vector<16x128xf32>
      %c0_11 = arith.constant 0 : index
      %c0_12 = arith.constant 0 : index
      %13 = vector.load %arg7[%c0_11, %c0_12] : memref<16x128xf32, #tpu.memory_space<vmem>>, vector<16x128xf32>
      tpu.vector_store %arg7[%c0_11, %c0_12], %12 {strides = array<i32>} : memref<16x128xf32, #tpu.memory_space<vmem>>, vector<16x128xf32>,
    } else {
    }
    %c0 = arith.constant 0 : index
    %c0_1 = arith.constant 0 : index
    %3 = vector.load %arg7[%c0, %c0_1] : memref<16x128xf32, #tpu.memory_space<vmem>>, vector<16x128xf32>
    %c0_2 = arith.constant 0 : index
    %c0_3 = arith.constant 0 : index
    %4 = vector.load %arg3[%c0_2, %c0_3] : memref<16x128xbf16, #tpu.memory_space<vmem>>, vector<16x128xbf16>
    %c0_4 = arith.constant 0 : index
    %c0_5 = arith.constant 0 : index
    %5 = vector.load %arg4[%c0_4, %c0_5] : memref<128x128xbf16, #tpu.memory_space<vmem>>, vector<128x128xbf16>
    %cst = arith.constant dense<0.000000e+00> : vector<16x128xf32>
    %6 = tpu.matmul %4, %5, %cst {dimension_numbers = #tpu.dot_dimension_numbers<[1], [0], [0], [1], [0, 0, 1, 1], [], []>} : vector<16x128xbf16>, vector<128x128xbf16>, vector<16x128xf32> -> vector<16x128xf32>
    %7 = arith.addf %3, %6 : vector<16x128xf32>
    %c0_6 = arith.constant 0 : index
    %c0_7 = arith.constant 0 : index
    %8 = vector.load %arg7[%c0_6, %c0_7] : memref<16x128xf32, #tpu.memory_space<vmem>>, vector<16x128xf32>
    tpu.vector_store %arg7[%c0_6, %c0_7], %7 {strides = array<i32>} : memref<16x128xf32, #tpu.memory_space<vmem>>, vector<16x128xf32>,
    %c0_i32_8 = arith.constant 0 : i32
    %9 = arith.cmpi eq, %arg2, %c0_i32_8 : i32
    %10 = arith.extui %9 : i1 to i32
    %c0_i32_9 = arith.constant 0 : i32
    %11 = arith.cmpi ne, %10, %c0_i32_9 : i32
    scf.if %11 {
      %c0_10 = arith.constant 0 : index
      %c0_11 = arith.constant 0 : index
      %12 = vector.load %arg7[%c0_10, %c0_11] : memref<16x128xf32, #tpu.memory_space<vmem>>, vector<16x128xf32>
      %c0_12 = arith.constant 0 : index
      %c0_13 = arith.constant 0 : index
      %13 = vector.load %arg5[%c0_12, %c0_13] : memref<1x128xf32, #tpu.memory_space<vmem>>, vector<1x128xf32>
      %14 = vector.broadcast %13 : vector<1x128xf32> to vector<16x128xf32>
      %15 = arith.addf %12, %14 : vector<16x128xf32>
      %16 = arith.mulf %15, %15 : vector<16x128xf32>
      %17 = arith.mulf %15, %16 : vector<16x128xf32>
      %cst_14 = arith.constant 4.471500e-02 : f32
      %18 = vector.broadcast %cst_14 : f32 to vector<16x128xf32>
      %19 = arith.mulf %18, %17 : vector<16x128xf32>
      %20 = arith.addf %15, %19 : vector<16x128xf32>
      %cst_15 = arith.constant 0.797884583 : f32
      %21 = vector.broadcast %cst_15 : f32 to vector<16x128xf32>
      %22 = arith.mulf %21, %20 : vector<16x128xf32>
      %23 = math.tanh %22 : vector<16x128xf32>
      %cst_16 = arith.constant 1.000000e+00 : f32
      %24 = vector.broadcast %cst_16 : f32 to vector<16x128xf32>
      %25 = arith.addf %24, %23 : vector<16x128xf32>
      %cst_17 = arith.constant 5.000000e-01 : f32
      %26 = vector.broadcast %cst_17 : f32 to vector<16x128xf32>
      %27 = arith.mulf %26, %25 : vector<16x128xf32>
      %28 = arith.mulf %15, %27 : vector<16x128xf32>
      %29 = arith.truncf %28 : vector<16x128xf32> to vector<16x128xbf16>
      %c0_18 = arith.constant 0 : index
      %c0_19 = arith.constant 0 : index
      %30 = vector.load %arg6[%c0_18, %c0_19] : memref<16x128xbf16, #tpu.memory_space<vmem>>, vector<16x128xbf16>
      tpu.vector_store %arg6[%c0_18, %c0_19], %29 {strides = array<i32>} : memref<16x128xbf16, #tpu.memory_space<vmem>>, vector<16x128xbf16>,
    } else {
    }
    return
  }
  func.func @transform_0(%arg0: i32, %arg1: i32, %arg2: i32) -> (i32, i32) {
    %c0_i32 = arith.constant 0 : i32
    return %arg0, %arg2 : i32, i32
  }
  func.func @transform_1(%arg0: i32, %arg1: i32, %arg2: i32) -> (i32, i32) {
    %c0_i32 = arith.constant 0 : i32
    return %arg2, %arg1 : i32, i32
  }
  func.func @transform_2(%arg0: i32, %arg1: i32, %arg2: i32) -> (i32, i32) {
    %c0_i32 = arith.constant 0 : i32
    %c0_i32_0 = arith.constant 0 : i32
    return %c0_i32, %arg1 : i32, i32
  }
  func.func @transform_3(%arg0: i32, %arg1: i32, %arg2: i32) -> (i32, i32) {
    %c0_i32 = arith.constant 0 : i32
    return %arg0, %arg1 : i32, i32
  }
}

module attributes {stable_mosaic.version = 11 : i64} {
  func.func @_ce_kernel(%arg0: i32, %arg1: memref<16x5xf32, #tpu.memory_space<vmem>>, %arg2: memref<16x1xi32, #tpu.memory_space<vmem>>, %arg3: memref<16x1xf32, #tpu.memory_space<vmem>>, %arg4: memref<1x1xf32, #tpu.memory_space<vmem>>, %arg5: memref<1x1xf32, #tpu.memory_space<vmem>>) attributes {dimension_semantics = [#tpu.dimension_semantics<arbitrary>], iteration_bounds = array<i64: 1>, scalar_prefetch = 0 : i64, scratch_operands = 1 : i64, tpu.core_type = #tpu.core_type<tc>, window_params = [{transform_indices = @transform_0, window_bounds = array<i64: 16, 5>}, {transform_indices = @transform_1, window_bounds = array<i64: 16, 1>}, {transform_indices = @transform_2, window_bounds = array<i64: 16, 1>}, {pipeline_mode = #tpu.pipeline_mode<synchronous>, transform_indices = @transform_3, window_bounds = array<i64: 1, 1>}]} {
    %c0_i32 = arith.constant 0 : i32
    %0 = arith.cmpi eq, %arg0, %c0_i32 : i32
    %1 = arith.extui %0 : i1 to i32
    %c0_i32_0 = arith.constant 0 : i32
    %2 = arith.cmpi ne, %1, %c0_i32_0 : i32
    scf.if %2 {
      %cst_16 = arith.constant 0.000000e+00 : f32
      %31 = vector.broadcast %cst_16 : f32 to vector<1x1xf32>
      %c0_17 = arith.constant 0 : index
      %c0_18 = arith.constant 0 : index
      %32 = vector.load %arg5[%c0_17, %c0_18] : memref<1x1xf32, #tpu.memory_space<vmem>>, vector<1x1xf32>
      tpu.vector_store %arg5[%c0_17, %c0_18], %31 {strides = array<i32>} : memref<1x1xf32, #tpu.memory_space<vmem>>, vector<1x1xf32>,
    } else {
    }
    %c0 = arith.constant 0 : index
    %c0_1 = arith.constant 0 : index
    %3 = vector.load %arg1[%c0, %c0_1] : memref<16x5xf32, #tpu.memory_space<vmem>>, vector<16x5xf32>
    %c0_2 = arith.constant 0 : index
    %c0_3 = arith.constant 0 : index
    %4 = vector.load %arg2[%c0_2, %c0_3] : memref<16x1xi32, #tpu.memory_space<vmem>>, vector<16x1xi32>
    %c0_4 = arith.constant 0 : index
    %c0_5 = arith.constant 0 : index
    %5 = vector.load %arg3[%c0_4, %c0_5] : memref<16x1xf32, #tpu.memory_space<vmem>>, vector<16x1xf32>
    %cst = arith.constant dense<0xFF800000> : vector<16xf32>
    %6 = vector.multi_reduction <maximumf>, %3, %cst [1] : vector<16x5xf32> to vector<16xf32>
    %7 = vector.shape_cast %6 : vector<16xf32> to vector<16x1xf32>
    %8 = vector.broadcast %7 : vector<16x1xf32> to vector<16x5xf32>
    %9 = arith.subf %3, %8 : vector<16x5xf32>
    %10 = math.exp %9 : vector<16x5xf32>
    %cst_6 = arith.constant dense<0.000000e+00> : vector<16xf32>
    %11 = vector.multi_reduction <add>, %10, %cst_6 [1] : vector<16x5xf32> to vector<16xf32>
    %12 = vector.shape_cast %11 : vector<16xf32> to vector<16x1xf32>
    %13 = math.log %12 : vector<16x1xf32>
    %14 = tpu.iota {dimensions = array<i32: 1>} : vector<16x5xi32>
    %15 = vector.broadcast %4 : vector<16x1xi32> to vector<16x5xi32>
    %16 = arith.cmpi eq, %14, %15 : vector<16x5xi32>
    %cst_7 = arith.constant 0.000000e+00 : f32
    %17 = vector.broadcast %cst_7 : f32 to vector<16x5xf32>
    %18 = arith.select %16, %9, %17 : vector<16x5xi1>, vector<16x5xf32>
    %cst_8 = arith.constant dense<0.000000e+00> : vector<16xf32>
    %19 = vector.multi_reduction <add>, %18, %cst_8 [1] : vector<16x5xf32> to vector<16xf32>
    %20 = vector.shape_cast %19 : vector<16xf32> to vector<16x1xf32>
    %21 = arith.subf %13, %20 : vector<16x1xf32>
    %22 = arith.mulf %21, %5 : vector<16x1xf32>
    %c0_9 = arith.constant 0 : index
    %c0_10 = arith.constant 0 : index
    %23 = vector.load %arg5[%c0_9, %c0_10] : memref<1x1xf32, #tpu.memory_space<vmem>>, vector<1x1xf32>
    %cst_11 = arith.constant dense<0.000000e+00> : vector<1xf32>
    %24 = vector.multi_reduction <add>, %22, %cst_11 [0] : vector<16x1xf32> to vector<1xf32>
    %25 = vector.shape_cast %24 : vector<1xf32> to vector<1x1xf32>
    %26 = arith.addf %23, %25 : vector<1x1xf32>
    %c0_12 = arith.constant 0 : index
    %c0_13 = arith.constant 0 : index
    %27 = vector.load %arg5[%c0_12, %c0_13] : memref<1x1xf32, #tpu.memory_space<vmem>>, vector<1x1xf32>
    tpu.vector_store %arg5[%c0_12, %c0_13], %26 {strides = array<i32>} : memref<1x1xf32, #tpu.memory_space<vmem>>, vector<1x1xf32>,
    %c0_i32_14 = arith.constant 0 : i32
    %28 = arith.cmpi eq, %arg0, %c0_i32_14 : i32
    %29 = arith.extui %28 : i1 to i32
    %c0_i32_15 = arith.constant 0 : i32
    %30 = arith.cmpi ne, %29, %c0_i32_15 : i32
    scf.if %30 {
      %c0_16 = arith.constant 0 : index
      %c0_17 = arith.constant 0 : index
      %31 = vector.load %arg5[%c0_16, %c0_17] : memref<1x1xf32, #tpu.memory_space<vmem>>, vector<1x1xf32>
      %cst_18 = arith.constant 1.600000e+01 : f32
      %32 = vector.broadcast %cst_18 : f32 to vector<1x1xf32>
      %33 = arith.divf %31, %32 : vector<1x1xf32>
      %c0_19 = arith.constant 0 : index
      %c0_20 = arith.constant 0 : index
      %34 = vector.load %arg4[%c0_19, %c0_20] : memref<1x1xf32, #tpu.memory_space<vmem>>, vector<1x1xf32>
      tpu.vector_store %arg4[%c0_19, %c0_20], %33 {strides = array<i32>} : memref<1x1xf32, #tpu.memory_space<vmem>>, vector<1x1xf32>,
    } else {
    }
    return
  }
  func.func @transform_0(%arg0: i32) -> (i32, i32) {
    %c0_i32 = arith.constant 0 : i32
    %c0_i32_0 = arith.constant 0 : i32
    return %arg0, %c0_i32 : i32, i32
  }
  func.func @transform_1(%arg0: i32) -> (i32, i32) {
    %c0_i32 = arith.constant 0 : i32
    %c0_i32_0 = arith.constant 0 : i32
    return %arg0, %c0_i32 : i32, i32
  }
  func.func @transform_2(%arg0: i32) -> (i32, i32) {
    %c0_i32 = arith.constant 0 : i32
    %c0_i32_0 = arith.constant 0 : i32
    return %arg0, %c0_i32 : i32, i32
  }
  func.func @transform_3(%arg0: i32) -> (i32, i32) {
    %c0_i32 = arith.constant 0 : i32
    %c0_i32_0 = arith.constant 0 : i32
    %c0_i32_1 = arith.constant 0 : i32
    return %c0_i32, %c0_i32_0 : i32, i32
  }
}

module attributes {stable_mosaic.version = 11 : i64} {
  func.func @_linear_kernel(%arg0: i32, %arg1: i32, %arg2: i32, %arg3: memref<16x128xbf16, #tpu.memory_space<vmem>>, %arg4: memref<128x128xbf16, #tpu.memory_space<vmem>>, %arg5: memref<1x128xf32, #tpu.memory_space<vmem>>, %arg6: memref<16x128xf32, #tpu.memory_space<vmem>>, %arg7: memref<16x128xf32, #tpu.memory_space<vmem>>) attributes {dimension_semantics = [#tpu.dimension_semantics<parallel>, #tpu.dimension_semantics<parallel>, #tpu.dimension_semantics<arbitrary>], iteration_bounds = array<i64: 1, 1, 1>, scalar_prefetch = 0 : i64, scratch_operands = 1 : i64, tpu.core_type = #tpu.core_type<tc>, window_params = [{transform_indices = @transform_0, window_bounds = array<i64: 16, 128>}, {transform_indices = @transform_1, window_bounds = array<i64: 128, 128>}, {transform_indices = @transform_2, window_bounds = array<i64: 1, 128>}, {transform_indices = @transform_3, window_bounds = array<i64: 16, 128>}]} {
    %c0_i32 = arith.constant 0 : i32
    %0 = arith.cmpi eq, %arg2, %c0_i32 : i32
    %1 = arith.extui %0 : i1 to i32
    %c0_i32_0 = arith.constant 0 : i32
    %2 = arith.cmpi ne, %1, %c0_i32_0 : i32
    scf.if %2 {
      %cst_10 = arith.constant 0.000000e+00 : f32
      %12 = vector.broadcast %cst_10 : f32 to vector<16x128xf32>
      %c0_11 = arith.constant 0 : index
      %c0_12 = arith.constant 0 : index
      %13 = vector.load %arg7[%c0_11, %c0_12] : memref<16x128xf32, #tpu.memory_space<vmem>>, vector<16x128xf32>
      tpu.vector_store %arg7[%c0_11, %c0_12], %12 {strides = array<i32>} : memref<16x128xf32, #tpu.memory_space<vmem>>, vector<16x128xf32>,
    } else {
    }
    %c0 = arith.constant 0 : index
    %c0_1 = arith.constant 0 : index
    %3 = vector.load %arg7[%c0, %c0_1] : memref<16x128xf32, #tpu.memory_space<vmem>>, vector<16x128xf32>
    %c0_2 = arith.constant 0 : index
    %c0_3 = arith.constant 0 : index
    %4 = vector.load %arg3[%c0_2, %c0_3] : memref<16x128xbf16, #tpu.memory_space<vmem>>, vector<16x128xbf16>
    %c0_4 = arith.constant 0 : index
    %c0_5 = arith.constant 0 : index
    %5 = vector.load %arg4[%c0_4, %c0_5] : memref<128x128xbf16, #tpu.memory_space<vmem>>, vector<128x128xbf16>
    %cst = arith.constant dense<0.000000e+00> : vector<16x128xf32>
    %6 = tpu.matmul %4, %5, %cst {dimension_numbers = #tpu.dot_dimension_numbers<[1], [0], [0], [1], [0, 0, 1, 1], [], []>} : vector<16x128xbf16>, vector<128x128xbf16>, vector<16x128xf32> -> vector<16x128xf32>
    %7 = arith.addf %3, %6 : vector<16x128xf32>
    %c0_6 = arith.constant 0 : index
    %c0_7 = arith.constant 0 : index
    %8 = vector.load %arg7[%c0_6, %c0_7] : memref<16x128xf32, #tpu.memory_space<vmem>>, vector<16x128xf32>
    tpu.vector_store %arg7[%c0_6, %c0_7], %7 {strides = array<i32>} : memref<16x128xf32, #tpu.memory_space<vmem>>, vector<16x128xf32>,
    %c0_i32_8 = arith.constant 0 : i32
    %9 = arith.cmpi eq, %arg2, %c0_i32_8 : i32
    %10 = arith.extui %9 : i1 to i32
    %c0_i32_9 = arith.constant 0 : i32
    %11 = arith.cmpi ne, %10, %c0_i32_9 : i32
    scf.if %11 {
      %c0_10 = arith.constant 0 : index
      %c0_11 = arith.constant 0 : index
      %12 = vector.load %arg7[%c0_10, %c0_11] : memref<16x128xf32, #tpu.memory_space<vmem>>, vector<16x128xf32>
      %c0_12 = arith.constant 0 : index
      %c0_13 = arith.constant 0 : index
      %13 = vector.load %arg5[%c0_12, %c0_13] : memref<1x128xf32, #tpu.memory_space<vmem>>, vector<1x128xf32>
      %14 = vector.broadcast %13 : vector<1x128xf32> to vector<16x128xf32>
      %15 = arith.addf %12, %14 : vector<16x128xf32>
      %c0_14 = arith.constant 0 : index
      %c0_15 = arith.constant 0 : index
      %16 = vector.load %arg6[%c0_14, %c0_15] : memref<16x128xf32, #tpu.memory_space<vmem>>, vector<16x128xf32>
      tpu.vector_store %arg6[%c0_14, %c0_15], %15 {strides = array<i32>} : memref<16x128xf32, #tpu.memory_space<vmem>>, vector<16x128xf32>,
    } else {
    }
    return
  }
  func.func @transform_0(%arg0: i32, %arg1: i32, %arg2: i32) -> (i32, i32) {
    %c0_i32 = arith.constant 0 : i32
    return %arg0, %arg2 : i32, i32
  }
  func.func @transform_1(%arg0: i32, %arg1: i32, %arg2: i32) -> (i32, i32) {
    %c0_i32 = arith.constant 0 : i32
    return %arg2, %arg1 : i32, i32
  }
  func.func @transform_2(%arg0: i32, %arg1: i32, %arg2: i32) -> (i32, i32) {
    %c0_i32 = arith.constant 0 : i32
    %c0_i32_0 = arith.constant 0 : i32
    return %c0_i32, %arg1 : i32, i32
  }
  func.func @transform_3(%arg0: i32, %arg1: i32, %arg2: i32) -> (i32, i32) {
    %c0_i32 = arith.constant 0 : i32
    return %arg0, %arg1 : i32, i32
  }
}

</mosaic_0001>

<bundles_post_ra>
// kernel: entity_model_forward.18
= control target key start
LH: loop header
LB: loop body
LE: loop exit
PB: predicated region body
PF: predicated region fallthrough
CT: control target
= control target key end

     0   :  { %s235_s1 = inlined_call_operand.vmem [shape: bf16[128,128], index: 1, kind: input, shape index: {}]   ;;  %s236_s2 = inlined_call_operand.vmem [shape: f32[1,128], index: 2, kind: input, shape index: {}]   ;;  %s237_s0 = inlined_call_operand.vmem [shape: bf16[16,128], index: 0, kind: input, shape index: {}]   ;;  %s238_s3 = inlined_call_operand.vmem [shape: bf16[16,128], index: 3, kind: output, shape index: {}]  }
   0x1   :  { %v175_v0 = vld [vmem:[%s235_s1 + $0x38] sm:$0xff]  ;;  %v174_v1 = vld [vmem:[%s235_s1 + $0x30] sm:$0xff]  ;;  %v173_v2 = vld [vmem:[%s235_s1 + $0x28] sm:$0xff] }
   0x2   :  { %94 = vmatpush.bf16.msra.mxu0 %v175_v0  ;;  %v172_v3 = vld [vmem:[%s235_s1 + $0x20] sm:$0xff]  ;;  %v171_v4 = vld [vmem:[%s235_s1 + $0x18] sm:$0xff]  ;;  %v170_v5 = vld [vmem:[%s235_s1 + $0x10] sm:$0xff] }
   0x3   :  { %v169_v6 = vld [vmem:[%s235_s1 + $0x8] sm:$0xff]  ;;  %v168_v7 = vld [vmem:[%s235_s1] sm:$0xff] }
   0x4   :  { %v167_v8 = vld [vmem:[%s237_s0] sm:$0xff] }
   0x5   :  { %v181_v10 = vld [vmem:[%s236_s2] ss:$0 sm:$0xff] }
   0x6   :  { %95 = vmatpush.bf16.msra.mxu0 %v174_v1 }
   0xa   :  { %96 = vmatpush.bf16.msra.mxu0 %v173_v2 }
   0xe   :  { %97 = vmatpush.bf16.msra.mxu0 %v172_v3 }
  0x12   :  { %98 = vmatpush.bf16.msra.mxu0 %v171_v4 }
  0x16   :  { %99 = vmatpush.bf16.msra.mxu0 %v170_v5 }
  0x1a   :  { %100 = vmatpush.bf16.msra.mxu0 %v169_v6 }
  0x1e   :  { %101 = vmatpush.bf16.msra.mxu0 %v168_v7 }
  0x21   :  { %102 = vmatmul.bf16.vlgmr.msra.gmra.mxu0 %v167_v8 }
  0x9e   :  { %v103_v9 = vpop.f32.mrf.mxu0 }
  0x9f   :  { %v121_v12 = vadd.f32 %v181_v10, %v103_v9 }
  0xa6   :  { %v105_v11 = vpop.f32.mrf.mxu0 }
  0xa7   :  { %v122_v13 = vadd.f32 %v181_v10, %v105_v11 }
  0xa9   :  { %v179_v14 = vpack.c.bf16 %v122_v13, %v121_v12 }
  0xab   :  { %180 = vst [vmem:[%s238_s3] sm:$0xff] %v179_v14  }

// kernel: entity_model_forward.21
= control target key start
LH: loop header
LB: loop body
LE: loop exit
PB: predicated region body
PF: predicated region fallthrough
CT: control target
= control target key end

     0   :  { %vm27_vm0 = vcmask 261120   ;;  %v117_v10 = vmov 32.0   ;;  %vm93_vm6 = vcmask 257024   ;;  %s165_s0 = inlined_call_operand.vmem [shape: bf16[16,32], index: 0, kind: input, shape index: {}]   ;;  %s166_s1 = inlined_call_operand.vmem [shape: bf16[16,32], index: 1, kind: input, shape index: {}]   ;;  %s167_s2 = inlined_call_operand.vmem [shape: f32[1,32], index: 2, kind: input, shape index: {}]   ;;  %s168_s3 = inlined_call_operand.vmem [shape: f32[1,32], index: 3, kind: input, shape index: {}]   ;;  %s169_s4 = inlined_call_operand.vmem [shape: bf16[16,32], index: 4, kind: output, shape index: {}]  }
   0x1   :  { %v101_v0 = vld [vmem:[%s165_s0] sm:$0xff]   ;;  %111 = vrcp.f32 %v117_v10 }
   0x2   :  { %v105_v1 = vld [vmem:[%s166_s1] sm:$0xff]   ;;  %v102_v2 = vunpack.c.l.bf16 %v101_v0  ;;  %v103_v5 = vunpack.c.h.bf16 %v101_v0 }
   0x3   :  { %v106_v3 = vunpack.c.l.bf16 %v105_v1  ;;  %v107_v6 = vunpack.c.h.bf16 %v105_v1  ;;  %v109_v41 = vld [vmem:[%s167_s2] ss:$0 sm:$0xff] }
   0x4   :  { %v110_v44 = vld [vmem:[%s168_s3] ss:$0 sm:$0xff] }
   0x5   :  { %v25_v4 = vadd.f32 %v106_v3, %v102_v2  ;;  %v26_v8 = vadd.f32 %v107_v6, %v103_v5 }
   0x7   :  { %v28_v7 = vsel %vm27_vm0, %v25_v4, 0.0  ;;  %v31_v9 = vsel %vm27_vm0, %v26_v8, 0.0  ;;  %v112_v11 = vpop.eup %111 }
   0x8   :  { %29 = vadd.xlane.f32.xlu0 %v28_v7  ;;  %v35_v12 = vmul.f32 32.0, %v112_v11  ;;  %vm39_vm1 = vweird.f32 %v112_v11 }
   0xa   :  { %v36_v13 = vsub.f32 1.0, %v35_v12 }
   0xc   :  { %v37_v14 = vmul.f32 %v112_v11, %v36_v13 }
   0xe   :  { %v38_v15 = vadd.f32 %v112_v11, %v37_v14 }
  0x10   :  { %32 = vadd.xlane.f32.xlu0 %v31_v9  ;;  %v40_v16 = vsel %vm39_vm1, %v112_v11, %v38_v15 }
  0x7b   :  { %v30_v17 = vpop.xlane.xlu0 %29 }
  0x7c   :  { %v41_v18 = vmul.f32 %v40_v16, %v30_v17 }
  0x7e   :  { %v43_v19 = vsub.f32 %v25_v4, %v41_v18 }
  0x80   :  { %v45_v20 = vmul.f32 %v43_v19, %v43_v19 }
  0x82   :  { %v47_v21 = vsel %vm27_vm0, %v45_v20, 0.0 }
  0x83   :  { %48 = vadd.xlane.f32.xlu1 %v47_v21  ;;  %v33_v22 = vpop.xlane.xlu0 %32 }
  0x84   :  { %v42_v23 = vmul.f32 %v40_v16, %v33_v22 }
  0x86   :  { %v44_v24 = vsub.f32 %v26_v8, %v42_v23 }
  0x88   :  { %v46_v25 = vmul.f32 %v44_v24, %v44_v24 }
  0x8a   :  { %v50_v26 = vsel %vm27_vm0, %v46_v25, 0.0 }
  0x8b   :  { %51 = vadd.xlane.f32.xlu1 %v50_v26 }
  0xf6   :  { %v49_v27 = vpop.xlane.xlu1 %48 }
  0xf7   :  { %v53_v28 = vmul.f32 %v49_v27, %v40_v16 }
  0xf9   :  { %v55_v29 = vadd.f32 1e-12, %v53_v28 }
  0xfb   :  { %113 = vrsqrt.f32 %v55_v29  ;;  %vm63_vm3 = vweird.f32 %v55_v29 }
  0xfe   :  { %v52_v30 = vpop.xlane.xlu1 %51 }
  0xff   :  { %v54_v31 = vmul.f32 %v52_v30, %v40_v16 }
 0x101   :  { %v114_v32 = vpop.eup %113  ;;  %v56_v33 = vadd.f32 1e-12, %v54_v31 }
 0x102   :  { %v58_v34 = vmul.f32 %v114_v32, %v55_v29  ;;  %vm64_vm2 = vweird.f32 %v114_v32 }
 0x103   :  { %115 = vrsqrt.f32 %v56_v33  ;;  %vm65_vm4 = vmor %vm63_vm3, %vm64_vm2  ;;  %vm73_vm7 = vweird.f32 %v56_v33 }
 0x104   :  { %v59_v35 = vmul.f32 %v114_v32, %v58_v34 }
 0x106   :  { %v60_v36 = vmul.f32 0.5, %v59_v35 }
 0x108   :  { %v61_v37 = vsub.f32 1.5, %v60_v36 }
 0x109   :  { %v116_v38 = vpop.eup %115 }
 0x10a   :  { %v62_v39 = vmul.f32 %v114_v32, %v61_v37  ;;  %v68_v40 = vmul.f32 %v116_v38, %v56_v33  ;;  %vm74_vm5 = vweird.f32 %v116_v38 }
 0x10b   :  { %vm75_vm8 = vmor %vm73_vm7, %vm74_vm5 }
 0x10c   :  { %v66_v42 = vsel %vm65_vm4, %v114_v32, %v62_v39  ;;  %v69_v43 = vmul.f32 %v116_v38, %v68_v40 }
 0x10d   :  { %v77_v45 = vmul.f32 %v66_v42, %v43_v19 }
 0x10e   :  { %v70_v46 = vmul.f32 0.5, %v69_v43 }
 0x10f   :  { %v83_v47 = vmul.f32 %v109_v41, %v77_v45 }
 0x110   :  { %v71_v48 = vsub.f32 1.5, %v70_v46 }
 0x111   :  { %v89_v49 = vadd.f32 %v110_v44, %v83_v47 }
 0x112   :  { %v72_v50 = vmul.f32 %v116_v38, %v71_v48 }
 0x113   :  { %v91_v51 = vpack.c.bf16 %v89_v49, %v89_v49 }
 0x114   :  { %v76_v52 = vsel %vm75_vm8, %v116_v38, %v72_v50 }
 0x115   :  { %94 = vst.msk [vmem:[%s169_s4] sm:$0xf] %vm93_vm6, %v91_v51  ;;  %v78_v53 = vmul.f32 %v76_v52, %v44_v24 }
 0x117   :  { %v84_v54 = vmul.f32 %v109_v41, %v78_v53 }
 0x119   :  { %v90_v55 = vadd.f32 %v110_v44, %v84_v54 }
 0x11b   :  { %v92_v56 = vpack.c.bf16 %v90_v55, %v90_v55 }
 0x11d   :  { %95 = vst.msk [vmem:[%s169_s4 + $0x4] sm:$0xf] %vm93_vm6, %v92_v56 }

// kernel: entity_model_forward.17
= control target key start
LH: loop header
LB: loop body
LE: loop exit
PB: predicated region body
PF: predicated region fallthrough
CT: control target
= control target key end

     0   :  { %vm16_vm0 = vcmask 261120   ;;  %v98_v4 = vmov 32.0   ;;  %vm82_vm6 = vcmask 257024   ;;  %s141_s0 = inlined_call_operand.vmem [shape: f32[16,32], index: 0, kind: input, shape index: {}]   ;;  %s142_s1 = inlined_call_operand.vmem [shape: f32[1,32], index: 1, kind: input, shape index: {}]   ;;  %s143_s2 = inlined_call_operand.vmem [shape: f32[1,32], index: 2, kind: input, shape index: {}]   ;;  %s144_s3 = inlined_call_operand.vmem [shape: bf16[16,32], index: 3, kind: output, shape index: {}]  }
   0x1   :  { %v14_v0 = vld [vmem:[%s141_s0] sm:$0xff]  ;;  %v15_v2 = vld [vmem:[%s141_s0 + $0x8] sm:$0xff]  ;;  %92 = vrcp.f32 %v98_v4 }
   0x2   :  { %v17_v1 = vsel %vm16_vm0, %v14_v0, 0.0  ;;  %v20_v3 = vsel %vm16_vm0, %v15_v2, 0.0  ;;  %v90_v35 = vld [vmem:[%s142_s1] ss:$0 sm:$0xff] }
   0x3   :  { %18 = vadd.xlane.f32.xlu0 %v17_v1  ;;  %v91_v38 = vld [vmem:[%s143_s2] ss:$0 sm:$0xff] }
   0x7   :  { %v93_v5 = vpop.eup %92 }
   0x8   :  { %v24_v6 = vmul.f32 32.0, %v93_v5  ;;  %vm28_vm1 = vweird.f32 %v93_v5 }
   0xa   :  { %v25_v7 = vsub.f32 1.0, %v24_v6 }
   0xb   :  { %21 = vadd.xlane.f32.xlu0 %v20_v3 }
   0xc   :  { %v26_v8 = vmul.f32 %v93_v5, %v25_v7 }
   0xe   :  { %v27_v9 = vadd.f32 %v93_v5, %v26_v8 }
  0x10   :  { %v29_v10 = vsel %vm28_vm1, %v93_v5, %v27_v9 }
  0x76   :  { %v19_v11 = vpop.xlane.xlu0 %18 }
  0x77   :  { %v30_v12 = vmul.f32 %v29_v10, %v19_v11 }
  0x79   :  { %v32_v13 = vsub.f32 %v14_v0, %v30_v12 }
  0x7b   :  { %v34_v14 = vmul.f32 %v32_v13, %v32_v13 }
  0x7d   :  { %v36_v15 = vsel %vm16_vm0, %v34_v14, 0.0 }
  0x7e   :  { %37 = vadd.xlane.f32.xlu1 %v36_v15  ;;  %v22_v16 = vpop.xlane.xlu0 %21 }
  0x7f   :  { %v31_v17 = vmul.f32 %v29_v10, %v22_v16 }
  0x81   :  { %v33_v18 = vsub.f32 %v15_v2, %v31_v17 }
  0x83   :  { %v35_v19 = vmul.f32 %v33_v18, %v33_v18 }
  0x85   :  { %v39_v20 = vsel %vm16_vm0, %v35_v19, 0.0 }
  0x86   :  { %40 = vadd.xlane.f32.xlu1 %v39_v20 }
  0xf1   :  { %v38_v21 = vpop.xlane.xlu1 %37 }
  0xf2   :  { %v42_v22 = vmul.f32 %v38_v21, %v29_v10 }
  0xf4   :  { %v44_v23 = vadd.f32 1e-12, %v42_v22 }
  0xf6   :  { %94 = vrsqrt.f32 %v44_v23  ;;  %vm52_vm3 = vweird.f32 %v44_v23 }
  0xf9   :  { %v41_v24 = vpop.xlane.xlu1 %40 }
  0xfa   :  { %v43_v25 = vmul.f32 %v41_v24, %v29_v10 }
  0xfc   :  { %v95_v26 = vpop.eup %94  ;;  %v45_v27 = vadd.f32 1e-12, %v43_v25 }
  0xfd   :  { %v47_v28 = vmul.f32 %v95_v26, %v44_v23  ;;  %vm53_vm2 = vweird.f32 %v95_v26 }
  0xfe   :  { %96 = vrsqrt.f32 %v45_v27  ;;  %vm54_vm4 = vmor %vm52_vm3, %vm53_vm2  ;;  %vm62_vm7 = vweird.f32 %v45_v27 }
  0xff   :  { %v48_v29 = vmul.f32 %v95_v26, %v47_v28 }
 0x101   :  { %v49_v30 = vmul.f32 0.5, %v48_v29 }
 0x103   :  { %v50_v31 = vsub.f32 1.5, %v49_v30 }
 0x104   :  { %v97_v32 = vpop.eup %96 }
 0x105   :  { %v51_v33 = vmul.f32 %v95_v26, %v50_v31  ;;  %v57_v34 = vmul.f32 %v97_v32, %v45_v27  ;;  %vm63_vm5 = vweird.f32 %v97_v32 }
 0x106   :  { %vm64_vm8 = vmor %vm62_vm7, %vm63_vm5 }
 0x107   :  { %v55_v36 = vsel %vm54_vm4, %v95_v26, %v51_v33  ;;  %v58_v37 = vmul.f32 %v97_v32, %v57_v34 }
 0x108   :  { %v66_v39 = vmul.f32 %v55_v36, %v32_v13 }
 0x109   :  { %v59_v40 = vmul.f32 0.5, %v58_v37 }
 0x10a   :  { %v72_v41 = vmul.f32 %v90_v35, %v66_v39 }
 0x10b   :  { %v60_v42 = vsub.f32 1.5, %v59_v40 }
 0x10c   :  { %v78_v43 = vadd.f32 %v91_v38, %v72_v41 }
 0x10d   :  { %v61_v44 = vmul.f32 %v97_v32, %v60_v42 }
 0x10e   :  { %v80_v45 = vpack.c.bf16 %v78_v43, %v78_v43 }
 0x10f   :  { %v65_v46 = vsel %vm64_vm8, %v97_v32, %v61_v44 }
 0x110   :  { %83 = vst.msk [vmem:[%s144_s3] sm:$0xf] %vm82_vm6, %v80_v45  ;;  %v67_v47 = vmul.f32 %v65_v46, %v33_v18 }
 0x112   :  { %v73_v48 = vmul.f32 %v90_v35, %v67_v47 }
 0x114   :  { %v79_v49 = vadd.f32 %v91_v38, %v73_v48 }
 0x116   :  { %v81_v50 = vpack.c.bf16 %v79_v49, %v79_v49 }
 0x118   :  { %84 = vst.msk [vmem:[%s144_s3 + $0x4] sm:$0xf] %vm82_vm6, %v81_v50 }

// kernel: entity_model_forward.19
= control target key start
LH: loop header
LB: loop body
LE: loop exit
PB: predicated region body
PF: predicated region fallthrough
CT: control target
= control target key end

     0   :  { %s681_s15 = smov 0   ;;  %s750_s0 = inlined_call_operand.vmem [shape: bf16[2,8,32], index: 0, kind: input, shape index: {}]   ;;  %s751_s1 = inlined_call_operand.vmem [shape: bf16[2,8,32], index: 1, kind: input, shape index: {}]   ;;  %s752_s2 = inlined_call_operand.vmem [shape: bf16[2,8,32], index: 2, kind: input, shape index: {}]   ;;  %s753_s3 = inlined_call_operand.vmem [shape: f32[2,1,8], index: 3, kind: input, shape index: {}]   ;;  %s754_s4 = inlined_call_operand.vmem [shape: bf16[2,8,32], index: 4, kind: output, shape index: {}]  }
   0x1 LB: > { %s592_s16 = sadd.s32 4294967295, %s648_s15   ;;  %p596_p0 = scmp.ge.s32.totalorder %s648_s15, 1  ;;  %s648_s15 = sphi %s681_s15, %s14_s15  }
   0x2   : > { %p187_p1 = scmp.lt.s32.totalorder %s648_s15, 3 }
   0x4   : > { %p188_p2 = pnand %p596_p0, %p187_p1 }
   0x5   : > { %p222_p3 = scmp.lt.s32.totalorder (!%p188_p2), %s592_s16, 1  ;;  %s650_s27 = smov (!%p188_p2), 112  }
   0x6   : > { %191 = sbr.rel (%p188_p2) target bundleno = 1085 (0x43d), region = 36  ;;  %s651_s28 = smov (!%p188_p2), 104  }
   0x7   : > { %s652_s29 = smov (!%p188_p2), 120   ;;  %s653_s7 = smov (!%p188_p2), 8  }
   0x8   : > { %s654_s8 = smov (!%p188_p2), 16   ;;  %s655_s9 = smov (!%p188_p2), 24  }
   0xb   : > { %s756_s16 = smov (!%p222_p3, %s592_s16), 1  ;;  %vm246_vm0 = vcmask 64512   ;;  %vm286_vm1 = vcmask 1043456   ;;  %vm499_vm2 = vcmask 130048   ;;  %vm501_vm3 = vcmask 195584  }
   0xc   : > { %s689_s17 = sshll.u32 %s756_s16, 2  ;;  %s236_s20 = scalar_lea.vmem %s753_s3, %s756_s16  ;;  %vm504_vm4 = vcmask 257024  }
   0xd   : > { %s229_s23 = scalar_lea.vmem %s751_s1, %s689_s17  ;;  %s225_s26 = scalar_lea.vmem %s750_s0, %s689_s17  ;;  %v625_v7 = vld [vmem:[%s236_s20] ss:$0 sm:$0xff] }
   0xe   : > { %v243_v0 = vld [vmem:[%s229_s23] sm:$0xf]  ;;  %s233_s6 = scalar_lea.vmem %s752_s2, %s689_s17  ;;  %s240_s12 = scalar_lea.vmem %s754_s4, %s689_s17 }
   0xf   : > { %v251_v1 = vsel %vm246_vm0, %v243_v0, 0  ;;  %v242_v2 = vld [vmem:[%s225_s26] sm:$0xf]  ;;  %v309_v3 = vunpack.c.l.b16 %v243_v0 }
  0x10   : > { %260 = vmatpush.bf16.xpose.msra.mxu0 %v251_v1  ;;  %v304_v5 = vunpack.c.l.b16 %v242_v2  ;;  %v244_v23 = vld [vmem:[%s233_s6] sm:$0xf] }
  0x11   : > { %v310_v4 = vpack.c.b16 %v309_v3, %v309_v3  ;;  %v288_v24 = vsel %vm286_vm1, %v244_v23, 0  ;;  %v347_v50 = vunpack.c.l.b16 %v244_v23 }
  0x12   : > { %v305_v6 = vpack.c.b16 %v304_v5, %v304_v5  ;;  %297 = vmatpush.bf16.msra.mxu1 %v288_v24 }
  0x13   : > { %372 = vrot.lane.b32.xlu2 %v310_v4, %s650_s27  ;;  %v348_v51 = vpack.c.b16 %v347_v50, %v347_v50 }
  0x17   : > { %601 = vmatmul.msk.bf16.vlgmr.msra.gmra.mxu0 %vm246_vm0, %v242_v2 }
  0x1b   : > { %430 = vrot.lane.b32.xlu2 %v310_v4, %s651_s28 }
  0x23   : > { %370 = vrot.lane.b32.xlu2 %v305_v6, %s650_s27 }
  0x2b   : > { %428 = vrot.lane.b32.xlu2 %v305_v6, %s651_s28 }
  0x6d   : > { %v373_v13 = vpop.permute.xlu2 %372 }
  0x6e   : > { %v378_v25 = vsel %vm246_vm0, %v373_v13, 0 }
  0x6f   : > { %387 = vmatpush.bf16.xpose.msrb.mxu1 %v378_v25 }
  0x75   : > { %v431_v14 = vpop.permute.xlu2 %430 }
  0x76   : > { %v436_v19 = vsel %vm246_vm0, %v431_v14, 0 }
  0x77   : > { %445 = vmatpush.bf16.xpose.msrb.mxu0 %v436_v19 }
  0x7d   : > { %v371_v18 = vpop.permute.xlu2 %370 }
  0x85   : > { %v429_v22 = vpop.permute.xlu2 %428 }
  0x86   : > { %607 = vmatmul.msk.bf16.vlgmr.msrb.gmra.mxu0 %vm246_vm0, %v429_v22 }
  0x94   : > { %v262_v8 = vpop.f32.mrf.mxu0 }
  0x95   : > { %v266_v9 = vmul.f32 0.35355338, %v262_v8 }
  0x97   : > { %v270_v10 = vadd.f32 %v625_v7, %v266_v9 }
  0x99   : > { %v271_v11 = vsel %vm246_vm0, %v270_v10, -inf }
  0x9a   : > { %272 = vmax.xlane.f32.xlu0 %v271_v11 }
  0x9c   : > { %v264_v12 = vpop.f32.mrf.mxu0 }
  0xae   : > { %311 = vrot.lane.b32.xlu0 %v310_v4, %s652_s29 }
 0x103   : > { %v447_v32 = vpop.f32.mrf.mxu0 }
 0x104   : > { %v451_v33 = vmul.f32 0.35355338, %v447_v32 }
 0x106   : > { %v452_v34 = vadd.f32 %v625_v7, %v451_v33 }
 0x108   : > { %v453_v35 = vsel %vm246_vm0, %v452_v34, -inf }
 0x10b   : > { %v449_v36 = vpop.f32.mrf.mxu0 }
 0x10d   : > { %v273_v15 = vpop.xlane.xlu0 %272 }
 0x10e   : > { %v274_v16 = vsub.f32 %v270_v10, %v273_v15 }
 0x110   : > { %v275_v17 = vmul.f32 1.442695, %v274_v16 }
 0x112   : > { %626 = vpow2.f32 %v275_v17 }
 0x118   : > { %v627_v20 = vpop.eup %626 }
 0x119   : > { %v277_v21 = vsel %vm246_vm0, %v627_v20, 0.0 }
 0x11a   : > { %278 = vadd.xlane.f32.xlu1 %v277_v21 }
 0x120   : > { %v312_v26 = vpop.permute.xlu0 %311 }
 0x121   : > { %v317_v27 = vsel %vm246_vm0, %v312_v26, 0 }
 0x122   : > { %326 = vmatpush.bf16.xpose.msra.mxu2 %v317_v27 }
 0x133   : > { %306 = vrot.lane.b32.xlu1 %v305_v6, %s652_s29 }
 0x15d   : > { %454 = vmax.xlane.f32.xlu1 %v453_v35 }
 0x18d   : > { %v279_v28 = vpop.xlane.xlu1 %278 }
 0x18e   : > { %628 = vrcp.f32 %v279_v28 }
 0x194   : > { %v629_v29 = vpop.eup %628 }
 0x195   : > { %v281_v30 = vmul.f32 %v629_v29, %v627_v20 }
 0x197   : > { %v282_v31 = vpack.c.bf16 %v281_v30, %v281_v30 }
 0x199   : > { %602 = vmatmul.msk.bf16.vlgmr.msra.gmra.mxu1 %vm246_vm0, %v282_v31 }
 0x1a5   : > { %v307_v37 = vpop.permute.xlu1 %306 }
 0x1a6   : > { %603 = vmatmul.msk.bf16.vlgmr.msra.gmra.mxu2 %vm246_vm0, %v307_v37 }
 0x1a9   : > { %605 = vmatmul.msk.bf16.vlgmr.msrb.gmra.mxu1 %vm246_vm0, %v371_v18 }
 0x1d0   : > { %v455_v54 = vpop.xlane.xlu1 %454 }
 0x1d1   : > { %v456_v58 = vsub.f32 %v452_v34, %v455_v54 }
 0x1d3   : > { %v457_v60 = vmul.f32 1.442695, %v456_v58 }
 0x216   : > { %v725_v38 = vpop.f32.mrf.mxu1 }
 0x21e   : > { %v301_v39 = vpop.f32.mrf.mxu1 }
 0x226   : > { %v389_v40 = vpop.f32.mrf.mxu1 }
 0x227   : > { %v393_v41 = vmul.f32 0.35355338, %v389_v40 }
 0x229   : > { %v328_v42 = vpop.f32.mrf.mxu2  ;;  %v394_v43 = vadd.f32 %v625_v7, %v393_v41 }
 0x22a   : > { %v332_v44 = vmul.f32 0.35355338, %v328_v42 }
 0x22b   : > { %v395_v45 = vsel %vm246_vm0, %v394_v43, -inf }
 0x22c   : > { %396 = vmax.xlane.f32.xlu2 %v395_v45  ;;  %v333_v46 = vadd.f32 %v625_v7, %v332_v44 }
 0x22e   : > { %v391_v47 = vpop.f32.mrf.mxu1  ;;  %v334_v48 = vsel %vm246_vm0, %v333_v46, -inf }
 0x22f   : > { %335 = vmax.xlane.f32.xlu0 %v334_v48 }
 0x231   : > { %v330_v49 = vpop.f32.mrf.mxu2 }
 0x244   : > { %349 = vrot.lane.b32.xlu2 %v348_v51, %s652_s29 }
 0x29f   : > { %v397_v52 = vpop.xlane.xlu2 %396 }
 0x2a0   : > { %v398_v53 = vsub.f32 %v394_v43, %v397_v52 }
 0x2a2   : > { %v399_v55 = vmul.f32 1.442695, %v398_v53  ;;  %v336_v56 = vpop.xlane.xlu0 %335 }
 0x2a3   : > { %v337_v57 = vsub.f32 %v333_v46, %v336_v56 }
 0x2a4   : > { %630 = vpow2.f32 %v399_v55 }
 0x2a5   : > { %v338_v59 = vmul.f32 1.442695, %v337_v57 }
 0x2a7   : > { %632 = vpow2.f32 %v338_v59  ;;  %v350_v3 = vpop.permute.xlu2 %349 }
 0x2a8   : > { %634 = vpow2.f32 %v457_v60  ;;  %v355_v4 = vsel %vm286_vm1, %v350_v3, 0 }
 0x2a9   : > { %364 = vmatpush.bf16.msra.mxu3 %v355_v4 }
 0x2aa   : > { %v631_v61 = vpop.eup %630 }
 0x2ab   : > { %v401_v62 = vsel %vm246_vm0, %v631_v61, 0.0 }
 0x2ac   : > { %402 = vadd.xlane.f32.xlu1 %v401_v62 }
 0x2ad   : > { %v633_v63 = vpop.eup %632 }
 0x2ae   : > { %v340_v0 = vsel %vm246_vm0, %v633_v63, 0.0  ;;  %v635_v1 = vpop.eup %634 }
 0x2af   : > { %341 = vadd.xlane.f32.xlu0 %v340_v0  ;;  %v459_v2 = vsel %vm246_vm0, %v635_v1, 0.0 }
 0x2b7   : > { %460 = vadd.xlane.f32.xlu0 %v459_v2 }
 0x2c5   : > { %407 = vrot.lane.b32.xlu1 %v348_v51, %s650_s27 }
 0x2cb   : > { %465 = vrot.lane.b32.xlu0 %v348_v51, %s651_s28 }
 0x31f   : > { %v403_v8 = vpop.xlane.xlu1 %402 }
 0x322   : > { %v342_v5 = vpop.xlane.xlu0 %341 }
 0x323   : > { %636 = vrcp.f32 %v342_v5 }
 0x324   : > { %638 = vrcp.f32 %v403_v8 }
 0x329   : > { %v637_v6 = vpop.eup %636 }
 0x32a   : > { %v344_v7 = vmul.f32 %v637_v6, %v633_v63  ;;  %v461_v10 = vpop.xlane.xlu0 %460  ;;  %v639_v11 = vpop.eup %638 }
 0x32b   : > { %640 = vrcp.f32 %v461_v10  ;;  %v405_v13 = vmul.f32 %v639_v11, %v631_v61 }
 0x32c   : > { %v345_v9 = vpack.c.bf16 %v344_v7, %v344_v7 }
 0x32d   : > { %v406_v17 = vpack.c.bf16 %v405_v13, %v405_v13 }
 0x32e   : > { %604 = vmatmul.msk.bf16.vlgmr.msra.gmra.mxu3 %vm246_vm0, %v345_v9 }
 0x331   : > { %v641_v15 = vpop.eup %640 }
 0x332   : > { %v463_v16 = vmul.f32 %v641_v15, %v635_v1 }
 0x334   : > { %v464_v20 = vpack.c.bf16 %v463_v16, %v463_v16 }
 0x337   : > { %v408_v12 = vpop.permute.xlu1 %407 }
 0x338   : > { %v413_v14 = vsel %vm286_vm1, %v408_v12, 0 }
 0x339   : > { %422 = vmatpush.bf16.msrb.mxu3 %v413_v14 }
 0x33d   : > { %v466_v18 = vpop.permute.xlu0 %465 }
 0x33e   : > { %606 = vmatmul.msk.bf16.vlgmr.msrb.gmra.mxu3 %vm246_vm0, %v406_v17  ;;  %v471_v19 = vsel %vm286_vm1, %v466_v18, 0 }
 0x33f   : > { %480 = vmatpush.bf16.msrb.mxu2 %v471_v19 }
 0x342   : > { %608 = vmatmul.msk.bf16.vlgmr.msrb.gmra.mxu2 %vm246_vm0, %v464_v20 }
 0x3b1   : > { %v366_v21 = vpop.f32.mrf.mxu3 }
 0x3b2   : > { %487 = vrot.lane.b32.xlu2 %v366_v21, %s653_s7 }
 0x3b9   : > { %v368_v22 = vpop.f32.mrf.mxu3 }
 0x3c1   : > { %v424_v23 = vpop.f32.mrf.mxu3 }
 0x3c2   : > { %491 = vrot.lane.b32.xlu2 %v424_v23, %s654_s8 }
 0x3c5   : > { %v482_v24 = vpop.f32.mrf.mxu2 }
 0x3c6   : > { %495 = vrot.lane.b32.xlu0 %v482_v24, %s655_s9 }
 0x3c9   : > { %v426_v25 = vpop.f32.mrf.mxu3 }
 0x3cd   : > { %v484_v26 = vpop.f32.mrf.mxu2 }
 0x40c   : > { %v488_v27 = vpop.permute.xlu2 %487 }
 0x40d   : > { %v498_v29 = vsel %vm246_vm0, %v725_v38, %v488_v27 }
 0x41c   : > { %v492_v28 = vpop.permute.xlu2 %491 }
 0x41d   : > { %v500_v30 = vsel %vm499_vm2, %v498_v29, %v492_v28 }
 0x438   : > { %v496_v31 = vpop.permute.xlu0 %495 }
 0x439   : > { %v502_v32 = vsel %vm501_vm3, %v500_v30, %v496_v31 }
 0x43a   : > { %v503_v33 = vpack.c.bf16 %v502_v32, %v502_v32 }
 0x43c   : > { %505 = vst.msk [vmem:[%s240_s12] sm:$0xf] %vm504_vm4, %v503_v33 }
 0x43d PF: > { %s14_s15 = sadd.s32 1, %s648_s15  }
 0x43e   : > { %p11_p4 = scmp.ge.s32.totalorder %s14_s15, 4  }
 0x440   :  { %13 = sbr.rel (!%p11_p4) target bundleno = 1 (0x1), region = 75 }

// kernel: entity_model_forward.22
= control target key start
LH: loop header
LB: loop body
LE: loop exit
PB: predicated region body
PF: predicated region fallthrough
CT: control target
= control target key end

     0   :  { %s257_s1 = inlined_call_operand.vmem [shape: bf16[128,128], index: 1, kind: input, shape index: {}]   ;;  %s258_s2 = inlined_call_operand.vmem [shape: f32[1,128], index: 2, kind: input, shape index: {}]   ;;  %s259_s0 = inlined_call_operand.vmem [shape: bf16[16,128], index: 0, kind: input, shape index: {}]   ;;  %s260_s3 = inlined_call_operand.vmem [shape: bf16[16,128], index: 3, kind: output, shape index: {}]  }
   0x1   :  { %v193_v0 = vld [vmem:[%s257_s1 + $0x38] sm:$0xff]  ;;  %v192_v1 = vld [vmem:[%s257_s1 + $0x30] sm:$0xff]  ;;  %v191_v2 = vld [vmem:[%s257_s1 + $0x28] sm:$0xff] }
   0x2   :  { %94 = vmatpush.bf16.msra.mxu0 %v193_v0  ;;  %v190_v3 = vld [vmem:[%s257_s1 + $0x20] sm:$0xff]  ;;  %v189_v4 = vld [vmem:[%s257_s1 + $0x18] sm:$0xff]  ;;  %v188_v5 = vld [vmem:[%s257_s1 + $0x10] sm:$0xff] }
   0x3   :  { %v187_v6 = vld [vmem:[%s257_s1 + $0x8] sm:$0xff]  ;;  %v186_v7 = vld [vmem:[%s257_s1] sm:$0xff] }
   0x4   :  { %v185_v8 = vld [vmem:[%s259_s0] sm:$0xff] }
   0x5   :  { %v199_v9 = vld [vmem:[%s258_s2] ss:$0 sm:$0xff] }
   0x6   :  { %95 = vmatpush.bf16.msra.mxu0 %v192_v1 }
   0xa   :  { %96 = vmatpush.bf16.msra.mxu0 %v191_v2 }
   0xe   :  { %97 = vmatpush.bf16.msra.mxu0 %v190_v3 }
  0x12   :  { %98 = vmatpush.bf16.msra.mxu0 %v189_v4 }
  0x16   :  { %99 = vmatpush.bf16.msra.mxu0 %v188_v5 }
  0x1a   :  { %100 = vmatpush.bf16.msra.mxu0 %v187_v6 }
  0x1e   :  { %101 = vmatpush.bf16.msra.mxu0 %v186_v7 }
  0x21   :  { %102 = vmatmul.bf16.vlgmr.msra.gmra.mxu0 %v185_v8 }
  0x9e   :  { %v103_v10 = vpop.f32.mrf.mxu0 }
  0x9f   :  { %v121_v11 = vadd.f32 %v199_v9, %v103_v10 }
  0xa1   :  { %v123_v12 = vmul.f32 %v121_v11, %v121_v11 }
  0xa3   :  { %v125_v13 = vmul.f32 %v123_v12, %v121_v11 }
  0xa5   :  { %v127_v14 = vmul.f32 0.044715, %v125_v13 }
  0xa6   :  { %v105_v15 = vpop.f32.mrf.mxu0 }
  0xa7   :  { %v129_v16 = vadd.f32 %v127_v14, %v121_v11  ;;  %v122_v17 = vadd.f32 %v199_v9, %v105_v15 }
  0xa9   :  { %v131_v18 = vmul.f32 0.7978846, %v129_v16  ;;  %v124_v19 = vmul.f32 %v122_v17, %v122_v17 }
  0xab   :  { %v126_v20 = vmul.f32 %v124_v19, %v122_v17  ;;  %200 = vtanh.f32 %v131_v18 }
  0xad   :  { %v128_v21 = vmul.f32 0.044715, %v126_v20 }
  0xaf   :  { %v130_v22 = vadd.f32 %v128_v21, %v122_v17 }
  0xb1   :  { %v132_v23 = vmul.f32 0.7978846, %v130_v22  ;;  %v201_v24 = vpop.eup %200 }
  0xb2   :  { %v135_v25 = vadd.f32 1.0, %v201_v24 }
  0xb3   :  { %202 = vtanh.f32 %v132_v23 }
  0xb4   :  { %v137_v27 = vmul.f32 0.5, %v135_v25 }
  0xb6   :  { %v139_v30 = vmul.f32 %v137_v27, %v121_v11 }
  0xb9   :  { %v203_v26 = vpop.eup %202 }
  0xba   :  { %v136_v28 = vadd.f32 1.0, %v203_v26 }
  0xbc   :  { %v138_v29 = vmul.f32 0.5, %v136_v28 }
  0xbe   :  { %v140_v31 = vmul.f32 %v138_v29, %v122_v17 }
  0xc0   :  { %v197_v32 = vpack.c.bf16 %v140_v31, %v139_v30 }
  0xc2   :  { %198 = vst [vmem:[%s260_s3] sm:$0xff] %v197_v32  }

// kernel: entity_model_forward.33
= control target key start
LH: loop header
LB: loop body
LE: loop exit
PB: predicated region body
PF: predicated region fallthrough
CT: control target
= control target key end

     0   :  { %vm27_vm0 = vcmask 39936   ;;  %v157_v3 = vmov 0   ;;  %s211_s0 = inlined_call_operand.vmem [shape: f32[16,5], index: 0, kind: input, shape index: {}]   ;;  %s212_s1 = inlined_call_operand.vmem [shape: s32[16,1], index: 1, kind: input, shape index: {}]   ;;  %s213_s2 = inlined_call_operand.vmem [shape: f32[16,1], index: 2, kind: input, shape index: {}]   ;;  %s214_s3 = inlined_call_operand.hbm [shape: f32[1,1], index: 3, kind: output, shape index: {}]  }
   0x1   :  { %v21_v0 = vld [vmem:[%s211_s0] sm:$0xff]  ;;  %119 = vset.pattern.permute.xlu1 %v157_v3  ;;  %120 = vset.pattern.permute.xlu0 %v157_v3 }
   0x2   :  { %v23_v1 = vld [vmem:[%s212_s1] sm:$0xff]  ;;  %v28_v2 = vsel %vm27_vm0, %v21_v0, -inf }
   0x3   :  { %8 = vsyncpa [#allocation4], 0  ;;  %29 = vmax.xlane.f32.xlu0 %v28_v2  ;;  %53 = vperm.xlu1 %119, %v23_v1   ;;  %v22_v4 = vld [vmem:[%s211_s0 + $0x8] sm:$0xff]  ;;  %v50_v7 = vlaneseq  ;;  %vm19_vm3 = vcmask 0   ;;  %v158_v25 = vmov 0.0   ;;  %v25_v33 = vld [vmem:[%s213_s2] sm:$0xff] }
   0x4   :  { %v31_v5 = vsel %vm27_vm0, %v22_v4, -inf  ;;  %v24_v6 = vld [vmem:[%s212_s1 + $0x8] sm:$0xff]  ;;  %20 = vst.msk [vmem:[#allocation2] sm:$0x1] %vm19_vm3, %v158_v25  ;;  %vm73_vm4 = vcmask 7168   ;;  %v159_v39 = vmov 16.0  }
   0x5   :  { %v51_v8 = vand.u32 127, %v50_v7  ;;  %v26_v36 = vld [vmem:[%s213_s2 + $0x8] sm:$0xff]  ;;  %s160_s2 = smov [#allocation3]   ;;  %s106_s25 = sshll.u32 %s214_s3, 4  ;;  %s107_s25 = int_to_ptr.hbm [resolvable:$true] %s106_s25 }
   0x6   :  { %s104_s22 = sshll.u32 %s160_s2, 4  ;;  %s105_s22 = int_to_ptr.vmem [resolvable:$true] %s104_s22 }
   0xb   :  { %32 = vmax.xlane.f32.xlu0 %v31_v5  ;;  %56 = vperm.xlu1 %119, %v24_v6   ;;  %v72_v52 = vld [vmem:[#allocation2] sm:$0x1] }
  0x75   :  { %v54_v9 = vpop.permute.xlu1 %53 }
  0x76   :  { %v30_v10 = vpop.xlane.xlu0 %29  ;;  %vm58_vm1 = vcmp.eq.s32.totalorder %v51_v8, %v54_v9 }
  0x77   :  { %v34_v11 = vsub.f32 %v21_v0, %v30_v10 }
  0x79   :  { %v36_v12 = vmul.f32 1.442695, %v34_v11  ;;  %v60_v13 = vsel %vm58_vm1, %v34_v11, 0.0 }
  0x7a   :  { %v62_v14 = vsel %vm27_vm0, %v60_v13, 0.0 }
  0x7b   :  { %121 = vpow2.f32 %v36_v12  ;;  %63 = vadd.xlane.f32.xlu0 %v62_v14 }
  0x7d   :  { %v57_v15 = vpop.permute.xlu1 %56 }
  0x7e   :  { %v33_v16 = vpop.xlane.xlu0 %32  ;;  %vm59_vm2 = vcmp.eq.s32.totalorder %v51_v8, %v57_v15 }
  0x7f   :  { %v35_v17 = vsub.f32 %v22_v4, %v33_v16 }
  0x81   :  { %v122_v18 = vpop.eup %121  ;;  %v38_v19 = vmul.f32 1.442695, %v35_v17  ;;  %v61_v20 = vsel %vm59_vm2, %v35_v17, 0.0 }
  0x82   :  { %v40_v21 = vsel %vm27_vm0, %v122_v18, 0.0  ;;  %v65_v22 = vsel %vm27_vm0, %v61_v20, 0.0 }
  0x83   :  { %123 = vpow2.f32 %v38_v19  ;;  %41 = vadd.xlane.f32.xlu2 %v40_v21  ;;  %66 = vadd.xlane.f32.xlu1 %v65_v22 }
  0x89   :  { %v124_v23 = vpop.eup %123 }
  0x8a   :  { %v43_v24 = vsel %vm27_vm0, %v124_v23, 0.0 }
  0x8b   :  { %44 = vadd.xlane.f32.xlu2 %v43_v24 }
  0xee   :  { %v64_v30 = vpop.xlane.xlu0 %63 }
  0xf6   :  { %v42_v26 = vpop.xlane.xlu2 %41  ;;  %v67_v35 = vpop.xlane.xlu1 %66 }
  0xf7   :  { %125 = vlog2.f32 %v42_v26 }
  0xfd   :  { %v126_v27 = vpop.eup %125 }
  0xfe   :  { %v45_v28 = vpop.xlane.xlu2 %44  ;;  %v47_v29 = vmul.f32 0.6931472, %v126_v27 }
  0xff   :  { %127 = vlog2.f32 %v45_v28 }
 0x100   :  { %v68_v31 = vsub.f32 %v47_v29, %v64_v30  ;;  %129 = vrcp.f32 %v159_v39 }
 0x102   :  { %v70_v37 = vmul.f32 %v68_v31, %v25_v33 }
 0x104   :  { %v74_v41 = vsel %vm73_vm4, %v70_v37, 0.0 }
 0x105   :  { %v128_v32 = vpop.eup %127 }
 0x106   :  { %v49_v34 = vmul.f32 0.6931472, %v128_v32  ;;  %v130_v44 = vpop.eup %129 }
 0x107   :  { %v91_v47 = vmul.f32 16.0, %v130_v44  ;;  %vm95_vm5 = vweird.f32 %v130_v44 }
 0x108   :  { %v69_v38 = vsub.f32 %v49_v34, %v67_v35 }
 0x109   :  { %v92_v50 = vsub.f32 1.0, %v91_v47 }
 0x10a   :  { %v71_v40 = vmul.f32 %v69_v38, %v26_v36 }
 0x10b   :  { %v93_v54 = vmul.f32 %v130_v44, %v92_v50 }
 0x10c   :  { %v75_v42 = vsel %vm73_vm4, %v71_v40, 0.0 }
 0x10d   :  { %v76_v43 = vadd.f32 %v75_v42, %v74_v41  ;;  %v94_v56 = vadd.f32 %v130_v44, %v93_v54 }
 0x10f   :  { %v77_v45 = vrot.slane %v76_v43, 4  ;;  %v96_v57 = vsel %vm95_vm5, %v130_v44, %v94_v56 }
 0x111   :  { %v78_v46 = vadd.f32 %v77_v45, %v76_v43 }
 0x113   :  { %v79_v48 = vrot.slane %v78_v46, 2 }
 0x115   :  { %v80_v49 = vadd.f32 %v79_v48, %v78_v46 }
 0x117   :  { %v81_v51 = vrot.slane %v80_v49, 1 }
 0x119   :  { %v82_v53 = vadd.f32 %v81_v51, %v80_v49 }
 0x11b   :  { %v83_v55 = vadd.f32 %v82_v53, %v72_v52 }
 0x11d   :  { %85 = vst.msk [vmem:[#allocation2] sm:$0x1] %vm19_vm3, %v83_v55 }
 0x124   :  { %v89_v58 = vld [vmem:[#allocation2] sm:$0x1] }
 0x125   :  { %v97_v59 = vmul.f32 %v96_v57, %v89_v58 }
 0x127   :  { %98 = vst.msk [vmem:[#allocation3] sm:$0x1] %vm19_vm3, %v97_v59 }
 0x128   :  { %109 = dma.vmem_to_hbm [thread:$0]  %s105_s22, 16, %s107_s25, [#allocation4]  }
 0x129   :  { %155 = dma.done.wait [#allocation4], 16  }
 0x12a   :  { %156 = vsyncadd [#allocation4], 4294967280 }
 0x12b   :  { %114 = vsyncpa [#allocation4], 1 }

// kernel: entity_model_forward.32
= control target key start
LH: loop header
LB: loop body
LE: loop exit
PB: predicated region body
PF: predicated region fallthrough
CT: control target
= control target key end

     0   :  { %s231_s1 = inlined_call_operand.vmem [shape: bf16[128,128], index: 1, kind: input, shape index: {}]   ;;  %s232_s2 = inlined_call_operand.vmem [shape: f32[1,128], index: 2, kind: input, shape index: {}]   ;;  %s233_s0 = inlined_call_operand.vmem [shape: bf16[16,128], index: 0, kind: input, shape index: {}]   ;;  %s234_s3 = inlined_call_operand.vmem [shape: f32[16,128], index: 3, kind: output, shape index: {}]  }
   0x1   :  { %v173_v0 = vld [vmem:[%s231_s1 + $0x38] sm:$0xff]  ;;  %v172_v1 = vld [vmem:[%s231_s1 + $0x30] sm:$0xff]  ;;  %v171_v2 = vld [vmem:[%s231_s1 + $0x28] sm:$0xff] }
   0x2   :  { %94 = vmatpush.bf16.msra.mxu0 %v173_v0  ;;  %v170_v3 = vld [vmem:[%s231_s1 + $0x20] sm:$0xff]  ;;  %v169_v4 = vld [vmem:[%s231_s1 + $0x18] sm:$0xff]  ;;  %v168_v5 = vld [vmem:[%s231_s1 + $0x10] sm:$0xff] }
   0x3   :  { %v167_v6 = vld [vmem:[%s231_s1 + $0x8] sm:$0xff]  ;;  %v166_v7 = vld [vmem:[%s231_s1] sm:$0xff] }
   0x4   :  { %v165_v8 = vld [vmem:[%s233_s0] sm:$0xff] }
   0x5   :  { %v174_v9 = vld [vmem:[%s232_s2] ss:$0 sm:$0xff] }
   0x6   :  { %95 = vmatpush.bf16.msra.mxu0 %v172_v1 }
   0xa   :  { %96 = vmatpush.bf16.msra.mxu0 %v171_v2 }
   0xe   :  { %97 = vmatpush.bf16.msra.mxu0 %v170_v3 }
  0x12   :  { %98 = vmatpush.bf16.msra.mxu0 %v169_v4 }
  0x16   :  { %99 = vmatpush.bf16.msra.mxu0 %v168_v5 }
  0x1a   :  { %100 = vmatpush.bf16.msra.mxu0 %v167_v6 }
  0x1e   :  { %101 = vmatpush.bf16.msra.mxu0 %v166_v7 }
  0x21   :  { %102 = vmatmul.bf16.vlgmr.msra.gmra.mxu0 %v165_v8 }
  0x9e   :  { %v103_v10 = vpop.f32.mrf.mxu0 }
  0x9f   :  { %v121_v11 = vadd.f32 %v174_v9, %v103_v10 }
  0xa1   :  { %123 = vst [vmem:[%s234_s3] sm:$0xff] %v121_v11 }
  0xa6   :  { %v105_v12 = vpop.f32.mrf.mxu0 }
  0xa7   :  { %v122_v13 = vadd.f32 %v174_v9, %v105_v12 }
  0xa9   :  { %124 = vst [vmem:[%s234_s3 + $0x8] sm:$0xff] %v122_v13 }

</bundles_post_ra>
